<compile_context>
chip_gen: v7x
topology: tpu7x:2x2x1
jax: 0.10.0
libtpu: 0.0.40
codegen_flags: <defaults>
</compile_context>

<pallas_src>
import jax
import jax.numpy as jnp
from jax.experimental import pallas as pl
from jax.experimental.pallas import tpu as pltpu

# ---- small, module-consistent config -------------------------------------
B = 2          # batch
S = 8          # sequence length
D = 32         # hidden size
H = 4          # attention heads
DH = D // H    # head dim
LAYERS = 2     # encoder layers
INTER = 64     # FFN intermediate size
VOCAB = 100
MAX_POS = 16
FC1_OUT = 256  # torch.nn.Linear(hidden+5, 256)
N_SCORES = 5
LN_EPS = 1e-12

# layout of the packed (N_VECS, D) vector table
_V_EMB_G, _V_EMB_B = 0, 1
_V_PER_LAYER = 6                       # bo, ln1_g, ln1_b, bo2, ln2_g, ln2_b
_V_POOL_B = 2 + LAYERS * _V_PER_LAYER
N_VECS = _V_POOL_B + 1

_VMEM = pl.BlockSpec(memory_space=pltpu.MemorySpace.VMEM)


def _layer_norm(x, g, b):
    mu = jnp.mean(x, axis=-1, keepdims=True)
    xc = x - mu
    var = jnp.mean(xc * xc, axis=-1, keepdims=True)
    return xc * jax.lax.rsqrt(var + LN_EPS) * g + b


def _gelu(x):
    # tanh-approx GELU (see TODO above re: exact erf GELU)
    return 0.5 * x * (1.0 + jnp.tanh(0.7978845608028654 * (x + 0.044715 * x * x * x)))


# ---------------------------------------------------------------------------
# Single fused kernel: embeddings-LN -> 2 encoder layers -> pooler -> head
# ---------------------------------------------------------------------------
def _fused_bert_kernel(
    emb_ref, bias_ref, scores_ref,
    vecs_ref, bqkv_ref, bi_ref,
    wqkv_ref, wo_ref, wi_ref, wo2_ref,
    pool_w_ref, fc1_wp_ref, fc1_ws_ref, fc1_b_ref, fc2_w_ref, fc2_b_ref,
    out_ref,
):
    # ---- embedding LayerNorm -----------------------------------------------
    x = _layer_norm(emb_ref[...], vecs_ref[_V_EMB_G:_V_EMB_G + 1, :],
                    vecs_ref[_V_EMB_B:_V_EMB_B + 1, :])            # (BS, D)

    # precomputed additive bias: 0 for same-batch valid keys, -1e9 otherwise.
    # Makes the single flattened (BS,BS) score matrix exactly equivalent to
    # per-batch masked attention.
    bias = bias_ref[...]                                            # (BS, BS)

    for l in range(LAYERS):
        vb = 2 + l * _V_PER_LAYER

        # ---- fused QKV projection (one MXU push; scale folded into Wq/bq) --
        qkv = (jnp.dot(x, wqkv_ref[l], preferred_element_type=jnp.float32)
               + bqkv_ref[l:l + 1, :])                              # (BS, 3D)

        # ---- per-head attention on static lane slices of qkv ---------------
        ctx_parts = []
        for h in range(H):
            qh = qkv[:, h * DH:(h + 1) * DH]
            kh = qkv[:, D + h * DH:D + (h + 1) * DH]
            vh = qkv[:, 2 * D + h * DH:2 * D + (h + 1) * DH]
            # contract last axes of q and k directly (no materialized k.T)
            s = jax.lax.dot_general(qh, kh, (((1,), (1,)), ((), ())),
                                    preferred_element_type=jnp.float32) + bias
            s = s - jnp.max(s, axis=-1, keepdims=True)
            p = jnp.exp(s)
            p = p * pl.reciprocal(jnp.sum(p, axis=-1, keepdims=True), approx=True)
            ctx_parts.append(jnp.dot(p, vh, preferred_element_type=jnp.float32))
        ctx = jnp.concatenate(ctx_parts, axis=-1)                   # (BS, D)

        # ---- single output projection on concatenated context --------------
        attn_out = (jnp.dot(ctx, wo_ref[l], preferred_element_type=jnp.float32)
                    + vecs_ref[vb:vb + 1, :])
        x = _layer_norm(attn_out + x,
                        vecs_ref[vb + 1:vb + 2, :], vecs_ref[vb + 2:vb + 3, :])

        # ---- feed-forward ---------------------------------------------------
        inter = _gelu(jnp.dot(x, wi_ref[l], preferred_element_type=jnp.float32)
                      + bi_ref[l:l + 1, :])
        ffn = (jnp.dot(inter, wo2_ref[l], preferred_element_type=jnp.float32)
               + vecs_ref[vb + 3:vb + 4, :])
        x = _layer_norm(ffn + x,
                        vecs_ref[vb + 4:vb + 5, :], vecs_ref[vb + 5:vb + 6, :])

    # ---- pooler on the CLS rows (static sublane slices) ---------------------
    cls = jnp.concatenate([x[b * S:b * S + 1, :] for b in range(B)], axis=0)  # (B, D)
    pooled = jnp.tanh(jnp.dot(cls, pool_w_ref[...], preferred_element_type=jnp.float32)
                      + vecs_ref[_V_POOL_B:_V_POOL_B + 1, :])

    # ---- classifier head: concat folded into split fc1 matmuls --------------
    hidden = (jnp.dot(pooled, fc1_wp_ref[...], preferred_element_type=jnp.float32)
              + jnp.dot(scores_ref[...], fc1_ws_ref[...], preferred_element_type=jnp.float32)
              + fc1_b_ref[...])
    hidden = jnp.maximum(hidden, 0.0)
    logits = (jnp.dot(hidden, fc2_w_ref[...], preferred_element_type=jnp.float32)
              + fc2_b_ref[...])
    out_ref[...] = 1.0 / (1.0 + jnp.exp(-logits))


# ---------------------------------------------------------------------------
# Parameter init (deterministic) — mirrors the PyTorch module's shapes
# ---------------------------------------------------------------------------
def init_params(key):
    keys = iter(jax.random.split(key, 64))

    def norm(shape):
        return 0.02 * jax.random.normal(next(keys), shape, jnp.float32)

    params = {
        "word_emb": norm((VOCAB, D)),
        "pos_emb": norm((MAX_POS, D)),
        "type_emb": norm((2, D)),
        "emb_ln_g": jnp.ones((D,), jnp.float32),
        "emb_ln_b": jnp.zeros((D,), jnp.float32),
        "layers": [],
        "pooler_w": norm((D, D)),
        "pooler_b": jnp.zeros((D,), jnp.float32),
        "fc1_w": norm((D + N_SCORES, FC1_OUT)),
        "fc1_b": jnp.zeros((FC1_OUT,), jnp.float32),
        "fc2_w": norm((FC1_OUT, 1)),
        "fc2_b": jnp.zeros((1,), jnp.float32),
    }
    for _ in range(LAYERS):
        params["layers"].append({
            "wq": norm((D, D)), "bq": jnp.zeros((D,), jnp.float32),
            "wk": norm((D, D)), "bk": jnp.zeros((D,), jnp.float32),
            "wv": norm((D, D)), "bv": jnp.zeros((D,), jnp.float32),
            "wo": norm((D, D)), "bo": jnp.zeros((D,), jnp.float32),
            "ln1_g": jnp.ones((D,), jnp.float32), "ln1_b": jnp.zeros((D,), jnp.float32),
            "wi": norm((D, INTER)), "bi": jnp.zeros((INTER,), jnp.float32),
            "wo2": norm((INTER, D)), "bo2": jnp.zeros((D,), jnp.float32),
            "ln2_g": jnp.ones((D,), jnp.float32), "ln2_b": jnp.zeros((D,), jnp.float32),
        })
    return params


def pack_params(params):
    """One-time (outside jit) packing into kernel-ready layouts."""
    scale = 1.0 / float(DH) ** 0.5
    layers = params["layers"]

    # fused QKV weight (L, D, 3D); softmax scale folded into the Q block.
    wqkv = jnp.stack(
        [jnp.concatenate([lp["wq"] * scale, lp["wk"], lp["wv"]], axis=1)
         for lp in layers], axis=0)
    bqkv = jnp.stack(
        [jnp.concatenate([lp["bq"] * scale, lp["bk"], lp["bv"]], axis=0)
         for lp in layers], axis=0)                                   # (L, 3D)

    # packed (N_VECS, D) vector table: LN params + D-sized biases.
    vec_rows = [params["emb_ln_g"], params["emb_ln_b"]]
    for lp in layers:
        vec_rows += [lp["bo"], lp["ln1_g"], lp["ln1_b"],
                     lp["bo2"], lp["ln2_g"], lp["ln2_b"]]
    vec_rows += [params["pooler_b"]]
    vecs = jnp.stack(vec_rows, axis=0)                                # (N_VECS, D)

    return {
        "word_emb": params["word_emb"],
        # pos + type(0) pre-summed (token_type_ids assumed all-zero)
        "pos_type_emb": params["pos_emb"] + params["type_emb"][0][None, :],
        "vecs": vecs,
        "bqkv": bqkv,
        "bi": jnp.stack([lp["bi"] for lp in layers], axis=0),         # (L, INTER)
        "wqkv": wqkv,                                                 # (L, D, 3D)
        "wo": jnp.stack([lp["wo"] for lp in layers], axis=0),         # (L, D, D)
        "wi": jnp.stack([lp["wi"] for lp in layers], axis=0),         # (L, D, INTER)
        "wo2": jnp.stack([lp["wo2"] for lp in layers], axis=0),       # (L, INTER, D)
        "pooler_w": params["pooler_w"],
        "fc1_wp": params["fc1_w"][:D, :],                             # (D, 256)
        "fc1_ws": params["fc1_w"][D:, :],                             # (5, 256)
        "fc1_b": params["fc1_b"].reshape(1, FC1_OUT),
        "fc2_w": params["fc2_w"],
        "fc2_b": params["fc2_b"].reshape(1, 1),
    }


# ---------------------------------------------------------------------------
# Forward pass: one pallas_call for the whole model (gathers stay in JAX)
# ---------------------------------------------------------------------------
def bert_classifier_forward(packed, input_ids, attention_mask, scores):
    Bm, Sm = input_ids.shape
    BSm = Bm * Sm

    # --- embeddings (table gather is glue), summed before the kernel
    we = packed["word_emb"][input_ids]                        # (B,S,D)
    emb = (we + packed["pos_type_emb"][:Sm][None, :, :]).astype(jnp.float32)
    emb = emb.reshape(BSm, D)

    # --- additive attention bias: block-diagonal batch mask + padding mask
    batch_ids = jnp.arange(BSm, dtype=jnp.int32) // Sm
    col_key = jnp.where(attention_mask.astype(jnp.float32).reshape(BSm) > 0.5,
                        batch_ids, -1)
    bias = jnp.where(batch_ids[:, None] == col_key[None, :],
                     0.0, -1e9).astype(jnp.float32)            # (BS, BS)

    args = (
        emb, bias, scores.astype(jnp.float32),
        packed["vecs"], packed["bqkv"], packed["bi"],
        packed["wqkv"], packed["wo"], packed["wi"], packed["wo2"],
        packed["pooler_w"], packed["fc1_wp"], packed["fc1_ws"],
        packed["fc1_b"], packed["fc2_w"], packed["fc2_b"],
    )

    return pl.pallas_call(
        _fused_bert_kernel,
        out_shape=jax.ShapeDtypeStruct((Bm, 1), jnp.float32),
        in_specs=[_VMEM] * len(args),
        out_specs=_VMEM,
    )(*args)


if __name__ == "__main__":
    root = jax.random.PRNGKey(0)
    k_param, k_ids, k_scores = jax.random.split(root, 3)

    params = init_params(k_param)
    packed = pack_params(params)                 # one-time, outside jit

    input_ids = jax.random.randint(k_ids, (B, S), 0, VOCAB, dtype=jnp.int32)
    attention_mask = jnp.ones((B, S), dtype=jnp.float32).at[:, -2:].set(0.0)
    scores = jax.random.uniform(k_scores, (B, N_SCORES), dtype=jnp.float32)

    fwd = jax.jit(bert_classifier_forward)
    out = fwd(packed, input_ids, attention_mask, scores)
    out = jax.block_until_ready(out)
    assert out.shape == (B, 1)
    print("KERNEL_OK")
</pallas_src>

<mosaic_0001>
module attributes {stable_mosaic.version = 11 : i64} {
  func.func @_fused_bert_kernel(%arg0: memref<16x32xf32, #tpu.memory_space<vmem>>, %arg1: memref<16x16xf32, #tpu.memory_space<vmem>>, %arg2: memref<2x5xf32, #tpu.memory_space<vmem>>, %arg3: memref<15x32xf32, #tpu.memory_space<vmem>>, %arg4: memref<2x96xf32, #tpu.memory_space<vmem>>, %arg5: memref<2x64xf32, #tpu.memory_space<vmem>>, %arg6: memref<2x32x96xf32, #tpu.memory_space<vmem>>, %arg7: memref<2x32x32xf32, #tpu.memory_space<vmem>>, %arg8: memref<2x32x64xf32, #tpu.memory_space<vmem>>, %arg9: memref<2x64x32xf32, #tpu.memory_space<vmem>>, %arg10: memref<32x32xf32, #tpu.memory_space<vmem>>, %arg11: memref<32x256xf32, #tpu.memory_space<vmem>>, %arg12: memref<5x256xf32, #tpu.memory_space<vmem>>, %arg13: memref<1x256xf32, #tpu.memory_space<vmem>>, %arg14: memref<256x1xf32, #tpu.memory_space<vmem>>, %arg15: memref<1x1xf32, #tpu.memory_space<vmem>>, %arg16: memref<2x1xf32, #tpu.memory_space<vmem>>) attributes {dimension_semantics = [], scalar_prefetch = 0 : i64, scratch_operands = 0 : i64, tpu.core_type = #tpu.core_type<tc>} {
    %c0 = arith.constant 0 : index
    %c0_0 = arith.constant 0 : index
    %0 = vector.load %arg0[%c0, %c0_0] : memref<16x32xf32, #tpu.memory_space<vmem>>, vector<16x32xf32>
    %c0_1 = arith.constant 0 : index
    %c0_2 = arith.constant 0 : index
    %1 = vector.load %arg3[%c0_1, %c0_2] : memref<15x32xf32, #tpu.memory_space<vmem>>, vector<1x32xf32>
    %c1 = arith.constant 1 : index
    %c0_3 = arith.constant 0 : index
    %2 = vector.load %arg3[%c1, %c0_3] : memref<15x32xf32, #tpu.memory_space<vmem>>, vector<1x32xf32>
    %cst = arith.constant dense<0.000000e+00> : vector<16xf32>
    %3 = vector.multi_reduction <add>, %0, %cst [1] : vector<16x32xf32> to vector<16xf32>
    %4 = vector.shape_cast %3 : vector<16xf32> to vector<16x1xf32>
    %cst_4 = arith.constant 3.200000e+01 : f32
    %5 = vector.broadcast %cst_4 : f32 to vector<16x1xf32>
    %6 = arith.divf %4, %5 : vector<16x1xf32>
    %7 = vector.broadcast %6 : vector<16x1xf32> to vector<16x32xf32>
    %8 = arith.subf %0, %7 : vector<16x32xf32>
    %9 = arith.mulf %8, %8 : vector<16x32xf32>
    %cst_5 = arith.constant dense<0.000000e+00> : vector<16xf32>
    %10 = vector.multi_reduction <add>, %9, %cst_5 [1] : vector<16x32xf32> to vector<16xf32>
    %11 = vector.shape_cast %10 : vector<16xf32> to vector<16x1xf32>
    %cst_6 = arith.constant 3.200000e+01 : f32
    %12 = vector.broadcast %cst_6 : f32 to vector<16x1xf32>
    %13 = arith.divf %11, %12 : vector<16x1xf32>
    %cst_7 = arith.constant 9.99999996E-13 : f32
    %14 = vector.broadcast %cst_7 : f32 to vector<16x1xf32>
    %15 = arith.addf %13, %14 : vector<16x1xf32>
    %16 = math.rsqrt %15 : vector<16x1xf32>
    %17 = vector.broadcast %16 : vector<16x1xf32> to vector<16x32xf32>
    %18 = arith.mulf %8, %17 : vector<16x32xf32>
    %19 = vector.broadcast %1 : vector<1x32xf32> to vector<16x32xf32>
    %20 = arith.mulf %18, %19 : vector<16x32xf32>
    %21 = vector.broadcast %2 : vector<1x32xf32> to vector<16x32xf32>
    %22 = arith.addf %20, %21 : vector<16x32xf32>
    %c0_8 = arith.constant 0 : index
    %c0_9 = arith.constant 0 : index
    %23 = vector.load %arg1[%c0_8, %c0_9] : memref<16x16xf32, #tpu.memory_space<vmem>>, vector<16x16xf32>
    %c0_10 = arith.constant 0 : index
    %c0_11 = arith.constant 0 : index
    %c0_12 = arith.constant 0 : index
    %24 = vector.load %arg6[%c0_10, %c0_11, %c0_12] : memref<2x32x96xf32, #tpu.memory_space<vmem>>, vector<1x32x96xf32>
    %25 = vector.shape_cast %24 : vector<1x32x96xf32> to vector<32x96xf32>
    %cst_13 = arith.constant dense<0.000000e+00> : vector<16x96xf32>
    %26 = tpu.matmul %22, %25, %cst_13 {dimension_numbers = #tpu.dot_dimension_numbers<[1], [0], [0], [1], [0, 0, 1, 1], [], []>} : vector<16x32xf32>, vector<32x96xf32>, vector<16x96xf32> -> vector<16x96xf32>
    %c0_14 = arith.constant 0 : index
    %c0_15 = arith.constant 0 : index
    %27 = vector.load %arg4[%c0_14, %c0_15] : memref<2x96xf32, #tpu.memory_space<vmem>>, vector<1x96xf32>
    %28 = vector.broadcast %27 : vector<1x96xf32> to vector<16x96xf32>
    %29 = arith.addf %26, %28 : vector<16x96xf32>
    %30 = vector.extract_strided_slice %29 {offsets = [0, 0], sizes = [16, 8], strides = [1, 1]} : vector<16x96xf32> to vector<16x8xf32>
    %31 = vector.extract_strided_slice %29 {offsets = [0, 32], sizes = [16, 8], strides = [1, 1]} : vector<16x96xf32> to vector<16x8xf32>
    %32 = vector.extract_strided_slice %29 {offsets = [0, 64], sizes = [16, 8], strides = [1, 1]} : vector<16x96xf32> to vector<16x8xf32>
    %cst_16 = arith.constant dense<0.000000e+00> : vector<16x16xf32>
    %33 = tpu.matmul %30, %31, %cst_16 {dimension_numbers = #tpu.dot_dimension_numbers<[1], [1], [0], [0], [0, 0, 1, 0], [], []>} : vector<16x8xf32>, vector<16x8xf32>, vector<16x16xf32> -> vector<16x16xf32>
    %34 = arith.addf %33, %23 : vector<16x16xf32>
    %cst_17 = arith.constant dense<0xFF800000> : vector<16xf32>
    %35 = vector.multi_reduction <maximumf>, %34, %cst_17 [1] : vector<16x16xf32> to vector<16xf32>
    %36 = vector.shape_cast %35 : vector<16xf32> to vector<16x1xf32>
    %37 = vector.broadcast %36 : vector<16x1xf32> to vector<16x16xf32>
    %38 = arith.subf %34, %37 : vector<16x16xf32>
    %39 = math.exp %38 : vector<16x16xf32>
    %cst_18 = arith.constant dense<0.000000e+00> : vector<16xf32>
    %40 = vector.multi_reduction <add>, %39, %cst_18 [1] : vector<16x16xf32> to vector<16xf32>
    %41 = vector.shape_cast %40 : vector<16xf32> to vector<16x1xf32>
    %42 = tpu.reciprocal %41 {approx = true} : vector<16x1xf32> -> vector<16x1xf32>
    %43 = vector.broadcast %42 : vector<16x1xf32> to vector<16x16xf32>
    %44 = arith.mulf %39, %43 : vector<16x16xf32>
    %cst_19 = arith.constant dense<0.000000e+00> : vector<16x8xf32>
    %45 = tpu.matmul %44, %32, %cst_19 {dimension_numbers = #tpu.dot_dimension_numbers<[1], [0], [0], [1], [0, 0, 1, 1], [], []>} : vector<16x16xf32>, vector<16x8xf32>, vector<16x8xf32> -> vector<16x8xf32>
    %46 = vector.extract_strided_slice %29 {offsets = [0, 8], sizes = [16, 8], strides = [1, 1]} : vector<16x96xf32> to vector<16x8xf32>
    %47 = vector.extract_strided_slice %29 {offsets = [0, 40], sizes = [16, 8], strides = [1, 1]} : vector<16x96xf32> to vector<16x8xf32>
    %48 = vector.extract_strided_slice %29 {offsets = [0, 72], sizes = [16, 8], strides = [1, 1]} : vector<16x96xf32> to vector<16x8xf32>
    %cst_20 = arith.constant dense<0.000000e+00> : vector<16x16xf32>
    %49 = tpu.matmul %46, %47, %cst_20 {dimension_numbers = #tpu.dot_dimension_numbers<[1], [1], [0], [0], [0, 0, 1, 0], [], []>} : vector<16x8xf32>, vector<16x8xf32>, vector<16x16xf32> -> vector<16x16xf32>
    %50 = arith.addf %49, %23 : vector<16x16xf32>
    %cst_21 = arith.constant dense<0xFF800000> : vector<16xf32>
    %51 = vector.multi_reduction <maximumf>, %50, %cst_21 [1] : vector<16x16xf32> to vector<16xf32>
    %52 = vector.shape_cast %51 : vector<16xf32> to vector<16x1xf32>
    %53 = vector.broadcast %52 : vector<16x1xf32> to vector<16x16xf32>
    %54 = arith.subf %50, %53 : vector<16x16xf32>
    %55 = math.exp %54 : vector<16x16xf32>
    %cst_22 = arith.constant dense<0.000000e+00> : vector<16xf32>
    %56 = vector.multi_reduction <add>, %55, %cst_22 [1] : vector<16x16xf32> to vector<16xf32>
    %57 = vector.shape_cast %56 : vector<16xf32> to vector<16x1xf32>
    %58 = tpu.reciprocal %57 {approx = true} : vector<16x1xf32> -> vector<16x1xf32>
    %59 = vector.broadcast %58 : vector<16x1xf32> to vector<16x16xf32>
    %60 = arith.mulf %55, %59 : vector<16x16xf32>
    %cst_23 = arith.constant dense<0.000000e+00> : vector<16x8xf32>
    %61 = tpu.matmul %60, %48, %cst_23 {dimension_numbers = #tpu.dot_dimension_numbers<[1], [0], [0], [1], [0, 0, 1, 1], [], []>} : vector<16x16xf32>, vector<16x8xf32>, vector<16x8xf32> -> vector<16x8xf32>
    %62 = vector.extract_strided_slice %29 {offsets = [0, 16], sizes = [16, 8], strides = [1, 1]} : vector<16x96xf32> to vector<16x8xf32>
    %63 = vector.extract_strided_slice %29 {offsets = [0, 48], sizes = [16, 8], strides = [1, 1]} : vector<16x96xf32> to vector<16x8xf32>
    %64 = vector.extract_strided_slice %29 {offsets = [0, 80], sizes = [16, 8], strides = [1, 1]} : vector<16x96xf32> to vector<16x8xf32>
    %cst_24 = arith.constant dense<0.000000e+00> : vector<16x16xf32>
    %65 = tpu.matmul %62, %63, %cst_24 {dimension_numbers = #tpu.dot_dimension_numbers<[1], [1], [0], [0], [0, 0, 1, 0], [], []>} : vector<16x8xf32>, vector<16x8xf32>, vector<16x16xf32> -> vector<16x16xf32>
    %66 = arith.addf %65, %23 : vector<16x16xf32>
    %cst_25 = arith.constant dense<0xFF800000> : vector<16xf32>
    %67 = vector.multi_reduction <maximumf>, %66, %cst_25 [1] : vector<16x16xf32> to vector<16xf32>
    %68 = vector.shape_cast %67 : vector<16xf32> to vector<16x1xf32>
    %69 = vector.broadcast %68 : vector<16x1xf32> to vector<16x16xf32>
    %70 = arith.subf %66, %69 : vector<16x16xf32>
    %71 = math.exp %70 : vector<16x16xf32>
    %cst_26 = arith.constant dense<0.000000e+00> : vector<16xf32>
    %72 = vector.multi_reduction <add>, %71, %cst_26 [1] : vector<16x16xf32> to vector<16xf32>
    %73 = vector.shape_cast %72 : vector<16xf32> to vector<16x1xf32>
    %74 = tpu.reciprocal %73 {approx = true} : vector<16x1xf32> -> vector<16x1xf32>
    %75 = vector.broadcast %74 : vector<16x1xf32> to vector<16x16xf32>
    %76 = arith.mulf %71, %75 : vector<16x16xf32>
    %cst_27 = arith.constant dense<0.000000e+00> : vector<16x8xf32>
    %77 = tpu.matmul %76, %64, %cst_27 {dimension_numbers = #tpu.dot_dimension_numbers<[1], [0], [0], [1], [0, 0, 1, 1], [], []>} : vector<16x16xf32>, vector<16x8xf32>, vector<16x8xf32> -> vector<16x8xf32>
    %78 = vector.extract_strided_slice %29 {offsets = [0, 24], sizes = [16, 8], strides = [1, 1]} : vector<16x96xf32> to vector<16x8xf32>
    %79 = vector.extract_strided_slice %29 {offsets = [0, 56], sizes = [16, 8], strides = [1, 1]} : vector<16x96xf32> to vector<16x8xf32>
    %80 = vector.extract_strided_slice %29 {offsets = [0, 88], sizes = [16, 8], strides = [1, 1]} : vector<16x96xf32> to vector<16x8xf32>
    %cst_28 = arith.constant dense<0.000000e+00> : vector<16x16xf32>
    %81 = tpu.matmul %78, %79, %cst_28 {dimension_numbers = #tpu.dot_dimension_numbers<[1], [1], [0], [0], [0, 0, 1, 0], [], []>} : vector<16x8xf32>, vector<16x8xf32>, vector<16x16xf32> -> vector<16x16xf32>
    %82 = arith.addf %81, %23 : vector<16x16xf32>
    %cst_29 = arith.constant dense<0xFF800000> : vector<16xf32>
    %83 = vector.multi_reduction <maximumf>, %82, %cst_29 [1] : vector<16x16xf32> to vector<16xf32>
    %84 = vector.shape_cast %83 : vector<16xf32> to vector<16x1xf32>
    %85 = vector.broadcast %84 : vector<16x1xf32> to vector<16x16xf32>
    %86 = arith.subf %82, %85 : vector<16x16xf32>
    %87 = math.exp %86 : vector<16x16xf32>
    %cst_30 = arith.constant dense<0.000000e+00> : vector<16xf32>
    %88 = vector.multi_reduction <add>, %87, %cst_30 [1] : vector<16x16xf32> to vector<16xf32>
    %89 = vector.shape_cast %88 : vector<16xf32> to vector<16x1xf32>
    %90 = tpu.reciprocal %89 {approx = true} : vector<16x1xf32> -> vector<16x1xf32>
    %91 = vector.broadcast %90 : vector<16x1xf32> to vector<16x16xf32>
    %92 = arith.mulf %87, %91 : vector<16x16xf32>
    %cst_31 = arith.constant dense<0.000000e+00> : vector<16x8xf32>
    %93 = tpu.matmul %92, %80, %cst_31 {dimension_numbers = #tpu.dot_dimension_numbers<[1], [0], [0], [1], [0, 0, 1, 1], [], []>} : vector<16x16xf32>, vector<16x8xf32>, vector<16x8xf32> -> vector<16x8xf32>
    %94 = tpu.concatenate %45, %61, %77, %93 in 1 : vector<16x8xf32>, vector<16x8xf32>, vector<16x8xf32>, vector<16x8xf32> -> vector<16x32xf32>
    %c0_32 = arith.constant 0 : index
    %c0_33 = arith.constant 0 : index
    %c0_34 = arith.constant 0 : index
    %95 = vector.load %arg7[%c0_32, %c0_33, %c0_34] : memref<2x32x32xf32, #tpu.memory_space<vmem>>, vector<1x32x32xf32>
    %96 = vector.shape_cast %95 : vector<1x32x32xf32> to vector<32x32xf32>
    %cst_35 = arith.constant dense<0.000000e+00> : vector<16x32xf32>
    %97 = tpu.matmul %94, %96, %cst_35 {dimension_numbers = #tpu.dot_dimension_numbers<[1], [0], [0], [1], [0, 0, 1, 1], [], []>} : vector<16x32xf32>, vector<32x32xf32>, vector<16x32xf32> -> vector<16x32xf32>
    %c2 = arith.constant 2 : index
    %c0_36 = arith.constant 0 : index
    %98 = vector.load %arg3[%c2, %c0_36] : memref<15x32xf32, #tpu.memory_space<vmem>>, vector<1x32xf32>
    %99 = vector.broadcast %98 : vector<1x32xf32> to vector<16x32xf32>
    %100 = arith.addf %97, %99 : vector<16x32xf32>
    %101 = arith.addf %100, %22 : vector<16x32xf32>
    %c3 = arith.constant 3 : index
    %c0_37 = arith.constant 0 : index
    %102 = vector.load %arg3[%c3, %c0_37] : memref<15x32xf32, #tpu.memory_space<vmem>>, vector<1x32xf32>
    %c4 = arith.constant 4 : index
    %c0_38 = arith.constant 0 : index
    %103 = vector.load %arg3[%c4, %c0_38] : memref<15x32xf32, #tpu.memory_space<vmem>>, vector<1x32xf32>
    %cst_39 = arith.constant dense<0.000000e+00> : vector<16xf32>
    %104 = vector.multi_reduction <add>, %101, %cst_39 [1] : vector<16x32xf32> to vector<16xf32>
    %105 = vector.shape_cast %104 : vector<16xf32> to vector<16x1xf32>
    %cst_40 = arith.constant 3.200000e+01 : f32
    %106 = vector.broadcast %cst_40 : f32 to vector<16x1xf32>
    %107 = arith.divf %105, %106 : vector<16x1xf32>
    %108 = vector.broadcast %107 : vector<16x1xf32> to vector<16x32xf32>
    %109 = arith.subf %101, %108 : vector<16x32xf32>
    %110 = arith.mulf %109, %109 : vector<16x32xf32>
    %cst_41 = arith.constant dense<0.000000e+00> : vector<16xf32>
    %111 = vector.multi_reduction <add>, %110, %cst_41 [1] : vector<16x32xf32> to vector<16xf32>
    %112 = vector.shape_cast %111 : vector<16xf32> to vector<16x1xf32>
    %cst_42 = arith.constant 3.200000e+01 : f32
    %113 = vector.broadcast %cst_42 : f32 to vector<16x1xf32>
    %114 = arith.divf %112, %113 : vector<16x1xf32>
    %cst_43 = arith.constant 9.99999996E-13 : f32
    %115 = vector.broadcast %cst_43 : f32 to vector<16x1xf32>
    %116 = arith.addf %114, %115 : vector<16x1xf32>
    %117 = math.rsqrt %116 : vector<16x1xf32>
    %118 = vector.broadcast %117 : vector<16x1xf32> to vector<16x32xf32>
    %119 = arith.mulf %109, %118 : vector<16x32xf32>
    %120 = vector.broadcast %102 : vector<1x32xf32> to vector<16x32xf32>
    %121 = arith.mulf %119, %120 : vector<16x32xf32>
    %122 = vector.broadcast %103 : vector<1x32xf32> to vector<16x32xf32>
    %123 = arith.addf %121, %122 : vector<16x32xf32>
    %c0_44 = arith.constant 0 : index
    %c0_45 = arith.constant 0 : index
    %c0_46 = arith.constant 0 : index
    %124 = vector.load %arg8[%c0_44, %c0_45, %c0_46] : memref<2x32x64xf32, #tpu.memory_space<vmem>>, vector<1x32x64xf32>
    %125 = vector.shape_cast %124 : vector<1x32x64xf32> to vector<32x64xf32>
    %cst_47 = arith.constant dense<0.000000e+00> : vector<16x64xf32>
    %126 = tpu.matmul %123, %125, %cst_47 {dimension_numbers = #tpu.dot_dimension_numbers<[1], [0], [0], [1], [0, 0, 1, 1], [], []>} : vector<16x32xf32>, vector<32x64xf32>, vector<16x64xf32> -> vector<16x64xf32>
    %c0_48 = arith.constant 0 : index
    %c0_49 = arith.constant 0 : index
    %127 = vector.load %arg5[%c0_48, %c0_49] : memref<2x64xf32, #tpu.memory_space<vmem>>, vector<1x64xf32>
    %128 = vector.broadcast %127 : vector<1x64xf32> to vector<16x64xf32>
    %129 = arith.addf %126, %128 : vector<16x64xf32>
    %cst_50 = arith.constant 5.000000e-01 : f32
    %130 = vector.broadcast %cst_50 : f32 to vector<16x64xf32>
    %131 = arith.mulf %130, %129 : vector<16x64xf32>
    %cst_51 = arith.constant 4.471500e-02 : f32
    %132 = vector.broadcast %cst_51 : f32 to vector<16x64xf32>
    %133 = arith.mulf %132, %129 : vector<16x64xf32>
    %134 = arith.mulf %133, %129 : vector<16x64xf32>
    %135 = arith.mulf %134, %129 : vector<16x64xf32>
    %136 = arith.addf %129, %135 : vector<16x64xf32>
    %cst_52 = arith.constant 0.797884583 : f32
    %137 = vector.broadcast %cst_52 : f32 to vector<16x64xf32>
    %138 = arith.mulf %137, %136 : vector<16x64xf32>
    %139 = math.tanh %138 : vector<16x64xf32>
    %cst_53 = arith.constant 1.000000e+00 : f32
    %140 = vector.broadcast %cst_53 : f32 to vector<16x64xf32>
    %141 = arith.addf %140, %139 : vector<16x64xf32>
    %142 = arith.mulf %131, %141 : vector<16x64xf32>
    %c0_54 = arith.constant 0 : index
    %c0_55 = arith.constant 0 : index
    %c0_56 = arith.constant 0 : index
    %143 = vector.load %arg9[%c0_54, %c0_55, %c0_56] : memref<2x64x32xf32, #tpu.memory_space<vmem>>, vector<1x64x32xf32>
    %144 = vector.shape_cast %143 : vector<1x64x32xf32> to vector<64x32xf32>
    %cst_57 = arith.constant dense<0.000000e+00> : vector<16x32xf32>
    %145 = tpu.matmul %142, %144, %cst_57 {dimension_numbers = #tpu.dot_dimension_numbers<[1], [0], [0], [1], [0, 0, 1, 1], [], []>} : vector<16x64xf32>, vector<64x32xf32>, vector<16x32xf32> -> vector<16x32xf32>
    %c5 = arith.constant 5 : index
    %c0_58 = arith.constant 0 : index
    %146 = vector.load %arg3[%c5, %c0_58] : memref<15x32xf32, #tpu.memory_space<vmem>>, vector<1x32xf32>
    %147 = vector.broadcast %146 : vector<1x32xf32> to vector<16x32xf32>
    %148 = arith.addf %145, %147 : vector<16x32xf32>
    %149 = arith.addf %148, %123 : vector<16x32xf32>
    %c6 = arith.constant 6 : index
    %c0_59 = arith.constant 0 : index
    %150 = vector.load %arg3[%c6, %c0_59] : memref<15x32xf32, #tpu.memory_space<vmem>>, vector<1x32xf32>
    %c7 = arith.constant 7 : index
    %c0_60 = arith.constant 0 : index
    %151 = vector.load %arg3[%c7, %c0_60] : memref<15x32xf32, #tpu.memory_space<vmem>>, vector<1x32xf32>
    %cst_61 = arith.constant dense<0.000000e+00> : vector<16xf32>
    %152 = vector.multi_reduction <add>, %149, %cst_61 [1] : vector<16x32xf32> to vector<16xf32>
    %153 = vector.shape_cast %152 : vector<16xf32> to vector<16x1xf32>
    %cst_62 = arith.constant 3.200000e+01 : f32
    %154 = vector.broadcast %cst_62 : f32 to vector<16x1xf32>
    %155 = arith.divf %153, %154 : vector<16x1xf32>
    %156 = vector.broadcast %155 : vector<16x1xf32> to vector<16x32xf32>
    %157 = arith.subf %149, %156 : vector<16x32xf32>
    %158 = arith.mulf %157, %157 : vector<16x32xf32>
    %cst_63 = arith.constant dense<0.000000e+00> : vector<16xf32>
    %159 = vector.multi_reduction <add>, %158, %cst_63 [1] : vector<16x32xf32> to vector<16xf32>
    %160 = vector.shape_cast %159 : vector<16xf32> to vector<16x1xf32>
    %cst_64 = arith.constant 3.200000e+01 : f32
    %161 = vector.broadcast %cst_64 : f32 to vector<16x1xf32>
    %162 = arith.divf %160, %161 : vector<16x1xf32>
    %cst_65 = arith.constant 9.99999996E-13 : f32
    %163 = vector.broadcast %cst_65 : f32 to vector<16x1xf32>
    %164 = arith.addf %162, %163 : vector<16x1xf32>
    %165 = math.rsqrt %164 : vector<16x1xf32>
    %166 = vector.broadcast %165 : vector<16x1xf32> to vector<16x32xf32>
    %167 = arith.mulf %157, %166 : vector<16x32xf32>
    %168 = vector.broadcast %150 : vector<1x32xf32> to vector<16x32xf32>
    %169 = arith.mulf %167, %168 : vector<16x32xf32>
    %170 = vector.broadcast %151 : vector<1x32xf32> to vector<16x32xf32>
    %171 = arith.addf %169, %170 : vector<16x32xf32>
    %c1_66 = arith.constant 1 : index
    %c0_67 = arith.constant 0 : index
    %c0_68 = arith.constant 0 : index
    %172 = vector.load %arg6[%c1_66, %c0_67, %c0_68] : memref<2x32x96xf32, #tpu.memory_space<vmem>>, vector<1x32x96xf32>
    %173 = vector.shape_cast %172 : vector<1x32x96xf32> to vector<32x96xf32>
    %cst_69 = arith.constant dense<0.000000e+00> : vector<16x96xf32>
    %174 = tpu.matmul %171, %173, %cst_69 {dimension_numbers = #tpu.dot_dimension_numbers<[1], [0], [0], [1], [0, 0, 1, 1], [], []>} : vector<16x32xf32>, vector<32x96xf32>, vector<16x96xf32> -> vector<16x96xf32>
    %c1_70 = arith.constant 1 : index
    %c0_71 = arith.constant 0 : index
    %175 = vector.load %arg4[%c1_70, %c0_71] : memref<2x96xf32, #tpu.memory_space<vmem>>, vector<1x96xf32>
    %176 = vector.broadcast %175 : vector<1x96xf32> to vector<16x96xf32>
    %177 = arith.addf %174, %176 : vector<16x96xf32>
    %178 = vector.extract_strided_slice %177 {offsets = [0, 0], sizes = [16, 8], strides = [1, 1]} : vector<16x96xf32> to vector<16x8xf32>
    %179 = vector.extract_strided_slice %177 {offsets = [0, 32], sizes = [16, 8], strides = [1, 1]} : vector<16x96xf32> to vector<16x8xf32>
    %180 = vector.extract_strided_slice %177 {offsets = [0, 64], sizes = [16, 8], strides = [1, 1]} : vector<16x96xf32> to vector<16x8xf32>
    %cst_72 = arith.constant dense<0.000000e+00> : vector<16x16xf32>
    %181 = tpu.matmul %178, %179, %cst_72 {dimension_numbers = #tpu.dot_dimension_numbers<[1], [1], [0], [0], [0, 0, 1, 0], [], []>} : vector<16x8xf32>, vector<16x8xf32>, vector<16x16xf32> -> vector<16x16xf32>
    %182 = arith.addf %181, %23 : vector<16x16xf32>
    %cst_73 = arith.constant dense<0xFF800000> : vector<16xf32>
    %183 = vector.multi_reduction <maximumf>, %182, %cst_73 [1] : vector<16x16xf32> to vector<16xf32>
    %184 = vector.shape_cast %183 : vector<16xf32> to vector<16x1xf32>
    %185 = vector.broadcast %184 : vector<16x1xf32> to vector<16x16xf32>
    %186 = arith.subf %182, %185 : vector<16x16xf32>
    %187 = math.exp %186 : vector<16x16xf32>
    %cst_74 = arith.constant dense<0.000000e+00> : vector<16xf32>
    %188 = vector.multi_reduction <add>, %187, %cst_74 [1] : vector<16x16xf32> to vector<16xf32>
    %189 = vector.shape_cast %188 : vector<16xf32> to vector<16x1xf32>
    %190 = tpu.reciprocal %189 {approx = true} : vector<16x1xf32> -> vector<16x1xf32>
    %191 = vector.broadcast %190 : vector<16x1xf32> to vector<16x16xf32>
    %192 = arith.mulf %187, %191 : vector<16x16xf32>
    %cst_75 = arith.constant dense<0.000000e+00> : vector<16x8xf32>
    %193 = tpu.matmul %192, %180, %cst_75 {dimension_numbers = #tpu.dot_dimension_numbers<[1], [0], [0], [1], [0, 0, 1, 1], [], []>} : vector<16x16xf32>, vector<16x8xf32>, vector<16x8xf32> -> vector<16x8xf32>
    %194 = vector.extract_strided_slice %177 {offsets = [0, 8], sizes = [16, 8], strides = [1, 1]} : vector<16x96xf32> to vector<16x8xf32>
    %195 = vector.extract_strided_slice %177 {offsets = [0, 40], sizes = [16, 8], strides = [1, 1]} : vector<16x96xf32> to vector<16x8xf32>
    %196 = vector.extract_strided_slice %177 {offsets = [0, 72], sizes = [16, 8], strides = [1, 1]} : vector<16x96xf32> to vector<16x8xf32>
    %cst_76 = arith.constant dense<0.000000e+00> : vector<16x16xf32>
    %197 = tpu.matmul %194, %195, %cst_76 {dimension_numbers = #tpu.dot_dimension_numbers<[1], [1], [0], [0], [0, 0, 1, 0], [], []>} : vector<16x8xf32>, vector<16x8xf32>, vector<16x16xf32> -> vector<16x16xf32>
    %198 = arith.addf %197, %23 : vector<16x16xf32>
    %cst_77 = arith.constant dense<0xFF800000> : vector<16xf32>
    %199 = vector.multi_reduction <maximumf>, %198, %cst_77 [1] : vector<16x16xf32> to vector<16xf32>
    %200 = vector.shape_cast %199 : vector<16xf32> to vector<16x1xf32>
    %201 = vector.broadcast %200 : vector<16x1xf32> to vector<16x16xf32>
    %202 = arith.subf %198, %201 : vector<16x16xf32>
    %203 = math.exp %202 : vector<16x16xf32>
    %cst_78 = arith.constant dense<0.000000e+00> : vector<16xf32>
    %204 = vector.multi_reduction <add>, %203, %cst_78 [1] : vector<16x16xf32> to vector<16xf32>
    %205 = vector.shape_cast %204 : vector<16xf32> to vector<16x1xf32>
    %206 = tpu.reciprocal %205 {approx = true} : vector<16x1xf32> -> vector<16x1xf32>
    %207 = vector.broadcast %206 : vector<16x1xf32> to vector<16x16xf32>
    %208 = arith.mulf %203, %207 : vector<16x16xf32>
    %cst_79 = arith.constant dense<0.000000e+00> : vector<16x8xf32>
    %209 = tpu.matmul %208, %196, %cst_79 {dimension_numbers = #tpu.dot_dimension_numbers<[1], [0], [0], [1], [0, 0, 1, 1], [], []>} : vector<16x16xf32>, vector<16x8xf32>, vector<16x8xf32> -> vector<16x8xf32>
    %210 = vector.extract_strided_slice %177 {offsets = [0, 16], sizes = [16, 8], strides = [1, 1]} : vector<16x96xf32> to vector<16x8xf32>
    %211 = vector.extract_strided_slice %177 {offsets = [0, 48], sizes = [16, 8], strides = [1, 1]} : vector<16x96xf32> to vector<16x8xf32>
    %212 = vector.extract_strided_slice %177 {offsets = [0, 80], sizes = [16, 8], strides = [1, 1]} : vector<16x96xf32> to vector<16x8xf32>
    %cst_80 = arith.constant dense<0.000000e+00> : vector<16x16xf32>
    %213 = tpu.matmul %210, %211, %cst_80 {dimension_numbers = #tpu.dot_dimension_numbers<[1], [1], [0], [0], [0, 0, 1, 0], [], []>} : vector<16x8xf32>, vector<16x8xf32>, vector<16x16xf32> -> vector<16x16xf32>
    %214 = arith.addf %213, %23 : vector<16x16xf32>
    %cst_81 = arith.constant dense<0xFF800000> : vector<16xf32>
    %215 = vector.multi_reduction <maximumf>, %214, %cst_81 [1] : vector<16x16xf32> to vector<16xf32>
    %216 = vector.shape_cast %215 : vector<16xf32> to vector<16x1xf32>
    %217 = vector.broadcast %216 : vector<16x1xf32> to vector<16x16xf32>
    %218 = arith.subf %214, %217 : vector<16x16xf32>
    %219 = math.exp %218 : vector<16x16xf32>
    %cst_82 = arith.constant dense<0.000000e+00> : vector<16xf32>
    %220 = vector.multi_reduction <add>, %219, %cst_82 [1] : vector<16x16xf32> to vector<16xf32>
    %221 = vector.shape_cast %220 : vector<16xf32> to vector<16x1xf32>
    %222 = tpu.reciprocal %221 {approx = true} : vector<16x1xf32> -> vector<16x1xf32>
    %223 = vector.broadcast %222 : vector<16x1xf32> to vector<16x16xf32>
    %224 = arith.mulf %219, %223 : vector<16x16xf32>
    %cst_83 = arith.constant dense<0.000000e+00> : vector<16x8xf32>
    %225 = tpu.matmul %224, %212, %cst_83 {dimension_numbers = #tpu.dot_dimension_numbers<[1], [0], [0], [1], [0, 0, 1, 1], [], []>} : vector<16x16xf32>, vector<16x8xf32>, vector<16x8xf32> -> vector<16x8xf32>
    %226 = vector.extract_strided_slice %177 {offsets = [0, 24], sizes = [16, 8], strides = [1, 1]} : vector<16x96xf32> to vector<16x8xf32>
    %227 = vector.extract_strided_slice %177 {offsets = [0, 56], sizes = [16, 8], strides = [1, 1]} : vector<16x96xf32> to vector<16x8xf32>
    %228 = vector.extract_strided_slice %177 {offsets = [0, 88], sizes = [16, 8], strides = [1, 1]} : vector<16x96xf32> to vector<16x8xf32>
    %cst_84 = arith.constant dense<0.000000e+00> : vector<16x16xf32>
    %229 = tpu.matmul %226, %227, %cst_84 {dimension_numbers = #tpu.dot_dimension_numbers<[1], [1], [0], [0], [0, 0, 1, 0], [], []>} : vector<16x8xf32>, vector<16x8xf32>, vector<16x16xf32> -> vector<16x16xf32>
    %230 = arith.addf %229, %23 : vector<16x16xf32>
    %cst_85 = arith.constant dense<0xFF800000> : vector<16xf32>
    %231 = vector.multi_reduction <maximumf>, %230, %cst_85 [1] : vector<16x16xf32> to vector<16xf32>
    %232 = vector.shape_cast %231 : vector<16xf32> to vector<16x1xf32>
    %233 = vector.broadcast %232 : vector<16x1xf32> to vector<16x16xf32>
    %234 = arith.subf %230, %233 : vector<16x16xf32>
    %235 = math.exp %234 : vector<16x16xf32>
    %cst_86 = arith.constant dense<0.000000e+00> : vector<16xf32>
    %236 = vector.multi_reduction <add>, %235, %cst_86 [1] : vector<16x16xf32> to vector<16xf32>
    %237 = vector.shape_cast %236 : vector<16xf32> to vector<16x1xf32>
    %238 = tpu.reciprocal %237 {approx = true} : vector<16x1xf32> -> vector<16x1xf32>
    %239 = vector.broadcast %238 : vector<16x1xf32> to vector<16x16xf32>
    %240 = arith.mulf %235, %239 : vector<16x16xf32>
    %cst_87 = arith.constant dense<0.000000e+00> : vector<16x8xf32>
    %241 = tpu.matmul %240, %228, %cst_87 {dimension_numbers = #tpu.dot_dimension_numbers<[1], [0], [0], [1], [0, 0, 1, 1], [], []>} : vector<16x16xf32>, vector<16x8xf32>, vector<16x8xf32> -> vector<16x8xf32>
    %242 = tpu.concatenate %193, %209, %225, %241 in 1 : vector<16x8xf32>, vector<16x8xf32>, vector<16x8xf32>, vector<16x8xf32> -> vector<16x32xf32>
    %c1_88 = arith.constant 1 : index
    %c0_89 = arith.constant 0 : index
    %c0_90 = arith.constant 0 : index
    %243 = vector.load %arg7[%c1_88, %c0_89, %c0_90] : memref<2x32x32xf32, #tpu.memory_space<vmem>>, vector<1x32x32xf32>
    %244 = vector.shape_cast %243 : vector<1x32x32xf32> to vector<32x32xf32>
    %cst_91 = arith.constant dense<0.000000e+00> : vector<16x32xf32>
    %245 = tpu.matmul %242, %244, %cst_91 {dimension_numbers = #tpu.dot_dimension_numbers<[1], [0], [0], [1], [0, 0, 1, 1], [], []>} : vector<16x32xf32>, vector<32x32xf32>, vector<16x32xf32> -> vector<16x32xf32>
    %c8 = arith.constant 8 : index
    %c0_92 = arith.constant 0 : index
    %246 = vector.load %arg3[%c8, %c0_92] : memref<15x32xf32, #tpu.memory_space<vmem>>, vector<1x32xf32>
    %247 = vector.broadcast %246 : vector<1x32xf32> to vector<16x32xf32>
    %248 = arith.addf %245, %247 : vector<16x32xf32>
    %249 = arith.addf %248, %171 : vector<16x32xf32>
    %c9 = arith.constant 9 : index
    %c0_93 = arith.constant 0 : index
    %250 = vector.load %arg3[%c9, %c0_93] : memref<15x32xf32, #tpu.memory_space<vmem>>, vector<1x32xf32>
    %c10 = arith.constant 10 : index
    %c0_94 = arith.constant 0 : index
    %251 = vector.load %arg3[%c10, %c0_94] : memref<15x32xf32, #tpu.memory_space<vmem>>, vector<1x32xf32>
    %cst_95 = arith.constant dense<0.000000e+00> : vector<16xf32>
    %252 = vector.multi_reduction <add>, %249, %cst_95 [1] : vector<16x32xf32> to vector<16xf32>
    %253 = vector.shape_cast %252 : vector<16xf32> to vector<16x1xf32>
    %cst_96 = arith.constant 3.200000e+01 : f32
    %254 = vector.broadcast %cst_96 : f32 to vector<16x1xf32>
    %255 = arith.divf %253, %254 : vector<16x1xf32>
    %256 = vector.broadcast %255 : vector<16x1xf32> to vector<16x32xf32>
    %257 = arith.subf %249, %256 : vector<16x32xf32>
    %258 = arith.mulf %257, %257 : vector<16x32xf32>
    %cst_97 = arith.constant dense<0.000000e+00> : vector<16xf32>
    %259 = vector.multi_reduction <add>, %258, %cst_97 [1] : vector<16x32xf32> to vector<16xf32>
    %260 = vector.shape_cast %259 : vector<16xf32> to vector<16x1xf32>
    %cst_98 = arith.constant 3.200000e+01 : f32
    %261 = vector.broadcast %cst_98 : f32 to vector<16x1xf32>
    %262 = arith.divf %260, %261 : vector<16x1xf32>
    %cst_99 = arith.constant 9.99999996E-13 : f32
    %263 = vector.broadcast %cst_99 : f32 to vector<16x1xf32>
    %264 = arith.addf %262, %263 : vector<16x1xf32>
    %265 = math.rsqrt %264 : vector<16x1xf32>
    %266 = vector.broadcast %265 : vector<16x1xf32> to vector<16x32xf32>
    %267 = arith.mulf %257, %266 : vector<16x32xf32>
    %268 = vector.broadcast %250 : vector<1x32xf32> to vector<16x32xf32>
    %269 = arith.mulf %267, %268 : vector<16x32xf32>
    %270 = vector.broadcast %251 : vector<1x32xf32> to vector<16x32xf32>
    %271 = arith.addf %269, %270 : vector<16x32xf32>
    %c1_100 = arith.constant 1 : index
    %c0_101 = arith.constant 0 : index
    %c0_102 = arith.constant 0 : index
    %272 = vector.load %arg8[%c1_100, %c0_101, %c0_102] : memref<2x32x64xf32, #tpu.memory_space<vmem>>, vector<1x32x64xf32>
    %273 = vector.shape_cast %272 : vector<1x32x64xf32> to vector<32x64xf32>
    %cst_103 = arith.constant dense<0.000000e+00> : vector<16x64xf32>
    %274 = tpu.matmul %271, %273, %cst_103 {dimension_numbers = #tpu.dot_dimension_numbers<[1], [0], [0], [1], [0, 0, 1, 1], [], []>} : vector<16x32xf32>, vector<32x64xf32>, vector<16x64xf32> -> vector<16x64xf32>
    %c1_104 = arith.constant 1 : index
    %c0_105 = arith.constant 0 : index
    %275 = vector.load %arg5[%c1_104, %c0_105] : memref<2x64xf32, #tpu.memory_space<vmem>>, vector<1x64xf32>
    %276 = vector.broadcast %275 : vector<1x64xf32> to vector<16x64xf32>
    %277 = arith.addf %274, %276 : vector<16x64xf32>
    %cst_106 = arith.constant 5.000000e-01 : f32
    %278 = vector.broadcast %cst_106 : f32 to vector<16x64xf32>
    %279 = arith.mulf %278, %277 : vector<16x64xf32>
    %cst_107 = arith.constant 4.471500e-02 : f32
    %280 = vector.broadcast %cst_107 : f32 to vector<16x64xf32>
    %281 = arith.mulf %280, %277 : vector<16x64xf32>
    %282 = arith.mulf %281, %277 : vector<16x64xf32>
    %283 = arith.mulf %282, %277 : vector<16x64xf32>
    %284 = arith.addf %277, %283 : vector<16x64xf32>
    %cst_108 = arith.constant 0.797884583 : f32
    %285 = vector.broadcast %cst_108 : f32 to vector<16x64xf32>
    %286 = arith.mulf %285, %284 : vector<16x64xf32>
    %287 = math.tanh %286 : vector<16x64xf32>
    %cst_109 = arith.constant 1.000000e+00 : f32
    %288 = vector.broadcast %cst_109 : f32 to vector<16x64xf32>
    %289 = arith.addf %288, %287 : vector<16x64xf32>
    %290 = arith.mulf %279, %289 : vector<16x64xf32>
    %c1_110 = arith.constant 1 : index
    %c0_111 = arith.constant 0 : index
    %c0_112 = arith.constant 0 : index
    %291 = vector.load %arg9[%c1_110, %c0_111, %c0_112] : memref<2x64x32xf32, #tpu.memory_space<vmem>>, vector<1x64x32xf32>
    %292 = vector.shape_cast %291 : vector<1x64x32xf32> to vector<64x32xf32>
    %cst_113 = arith.constant dense<0.000000e+00> : vector<16x32xf32>
    %293 = tpu.matmul %290, %292, %cst_113 {dimension_numbers = #tpu.dot_dimension_numbers<[1], [0], [0], [1], [0, 0, 1, 1], [], []>} : vector<16x64xf32>, vector<64x32xf32>, vector<16x32xf32> -> vector<16x32xf32>
    %c11 = arith.constant 11 : index
    %c0_114 = arith.constant 0 : index
    %294 = vector.load %arg3[%c11, %c0_114] : memref<15x32xf32, #tpu.memory_space<vmem>>, vector<1x32xf32>
    %295 = vector.broadcast %294 : vector<1x32xf32> to vector<16x32xf32>
    %296 = arith.addf %293, %295 : vector<16x32xf32>
    %297 = arith.addf %296, %271 : vector<16x32xf32>
    %c12 = arith.constant 12 : index
    %c0_115 = arith.constant 0 : index
    %298 = vector.load %arg3[%c12, %c0_115] : memref<15x32xf32, #tpu.memory_space<vmem>>, vector<1x32xf32>
    %c13 = arith.constant 13 : index
    %c0_116 = arith.constant 0 : index
    %299 = vector.load %arg3[%c13, %c0_116] : memref<15x32xf32, #tpu.memory_space<vmem>>, vector<1x32xf32>
    %cst_117 = arith.constant dense<0.000000e+00> : vector<16xf32>
    %300 = vector.multi_reduction <add>, %297, %cst_117 [1] : vector<16x32xf32> to vector<16xf32>
    %301 = vector.shape_cast %300 : vector<16xf32> to vector<16x1xf32>
    %cst_118 = arith.constant 3.200000e+01 : f32
    %302 = vector.broadcast %cst_118 : f32 to vector<16x1xf32>
    %303 = arith.divf %301, %302 : vector<16x1xf32>
    %304 = vector.broadcast %303 : vector<16x1xf32> to vector<16x32xf32>
    %305 = arith.subf %297, %304 : vector<16x32xf32>
    %306 = arith.mulf %305, %305 : vector<16x32xf32>
    %cst_119 = arith.constant dense<0.000000e+00> : vector<16xf32>
    %307 = vector.multi_reduction <add>, %306, %cst_119 [1] : vector<16x32xf32> to vector<16xf32>
    %308 = vector.shape_cast %307 : vector<16xf32> to vector<16x1xf32>
    %cst_120 = arith.constant 3.200000e+01 : f32
    %309 = vector.broadcast %cst_120 : f32 to vector<16x1xf32>
    %310 = arith.divf %308, %309 : vector<16x1xf32>
    %cst_121 = arith.constant 9.99999996E-13 : f32
    %311 = vector.broadcast %cst_121 : f32 to vector<16x1xf32>
    %312 = arith.addf %310, %311 : vector<16x1xf32>
    %313 = math.rsqrt %312 : vector<16x1xf32>
    %314 = vector.broadcast %313 : vector<16x1xf32> to vector<16x32xf32>
    %315 = arith.mulf %305, %314 : vector<16x32xf32>
    %316 = vector.broadcast %298 : vector<1x32xf32> to vector<16x32xf32>
    %317 = arith.mulf %315, %316 : vector<16x32xf32>
    %318 = vector.broadcast %299 : vector<1x32xf32> to vector<16x32xf32>
    %319 = arith.addf %317, %318 : vector<16x32xf32>
    %320 = vector.extract_strided_slice %319 {offsets = [0, 0], sizes = [1, 32], strides = [1, 1]} : vector<16x32xf32> to vector<1x32xf32>
    %321 = vector.extract_strided_slice %319 {offsets = [8, 0], sizes = [1, 32], strides = [1, 1]} : vector<16x32xf32> to vector<1x32xf32>
    %322 = tpu.concatenate %320, %321 in 0 : vector<1x32xf32>, vector<1x32xf32> -> vector<2x32xf32>
    %c0_122 = arith.constant 0 : index
    %c0_123 = arith.constant 0 : index
    %323 = vector.load %arg10[%c0_122, %c0_123] : memref<32x32xf32, #tpu.memory_space<vmem>>, vector<32x32xf32>
    %cst_124 = arith.constant dense<0.000000e+00> : vector<2x32xf32>
    %324 = tpu.matmul %322, %323, %cst_124 {dimension_numbers = #tpu.dot_dimension_numbers<[1], [0], [0], [1], [0, 0, 1, 1], [], []>} : vector<2x32xf32>, vector<32x32xf32>, vector<2x32xf32> -> vector<2x32xf32>
    %c14 = arith.constant 14 : index
    %c0_125 = arith.constant 0 : index
    %325 = vector.load %arg3[%c14, %c0_125] : memref<15x32xf32, #tpu.memory_space<vmem>>, vector<1x32xf32>
    %326 = vector.broadcast %325 : vector<1x32xf32> to vector<2x32xf32>
    %327 = arith.addf %324, %326 : vector<2x32xf32>
    %328 = math.tanh %327 : vector<2x32xf32>
    %c0_126 = arith.constant 0 : index
    %c0_127 = arith.constant 0 : index
    %329 = vector.load %arg11[%c0_126, %c0_127] : memref<32x256xf32, #tpu.memory_space<vmem>>, vector<32x256xf32>
    %cst_128 = arith.constant dense<0.000000e+00> : vector<2x256xf32>
    %330 = tpu.matmul %328, %329, %cst_128 {dimension_numbers = #tpu.dot_dimension_numbers<[1], [0], [0], [1], [0, 0, 1, 1], [], []>} : vector<2x32xf32>, vector<32x256xf32>, vector<2x256xf32> -> vector<2x256xf32>
    %c0_129 = arith.constant 0 : index
    %c0_130 = arith.constant 0 : index
    %331 = vector.load %arg2[%c0_129, %c0_130] : memref<2x5xf32, #tpu.memory_space<vmem>>, vector<2x5xf32>
    %c0_131 = arith.constant 0 : index
    %c0_132 = arith.constant 0 : index
    %332 = vector.load %arg12[%c0_131, %c0_132] : memref<5x256xf32, #tpu.memory_space<vmem>>, vector<5x256xf32>
    %cst_133 = arith.constant dense<0.000000e+00> : vector<2x256xf32>
    %333 = tpu.matmul %331, %332, %cst_133 {dimension_numbers = #tpu.dot_dimension_numbers<[1], [0], [0], [1], [0, 0, 1, 1], [], []>} : vector<2x5xf32>, vector<5x256xf32>, vector<2x256xf32> -> vector<2x256xf32>
    %334 = arith.addf %330, %333 : vector<2x256xf32>
    %c0_134 = arith.constant 0 : index
    %c0_135 = arith.constant 0 : index
    %335 = vector.load %arg13[%c0_134, %c0_135] : memref<1x256xf32, #tpu.memory_space<vmem>>, vector<1x256xf32>
    %336 = vector.broadcast %335 : vector<1x256xf32> to vector<2x256xf32>
    %337 = arith.addf %334, %336 : vector<2x256xf32>
    %cst_136 = arith.constant 0.000000e+00 : f32
    %338 = vector.broadcast %cst_136 : f32 to vector<2x256xf32>
    %339 = arith.maximumf %337, %338 : vector<2x256xf32>
    %c0_137 = arith.constant 0 : index
    %c0_138 = arith.constant 0 : index
    %340 = vector.load %arg14[%c0_137, %c0_138] : memref<256x1xf32, #tpu.memory_space<vmem>>, vector<256x1xf32>
    %cst_139 = arith.constant dense<0.000000e+00> : vector<2x1xf32>
    %341 = tpu.matmul %339, %340, %cst_139 {dimension_numbers = #tpu.dot_dimension_numbers<[1], [0], [0], [1], [0, 0, 1, 1], [], []>} : vector<2x256xf32>, vector<256x1xf32>, vector<2x1xf32> -> vector<2x1xf32>
    %c0_140 = arith.constant 0 : index
    %c0_141 = arith.constant 0 : index
    %342 = vector.load %arg15[%c0_140, %c0_141] : memref<1x1xf32, #tpu.memory_space<vmem>>, vector<1x1xf32>
    %343 = vector.broadcast %342 : vector<1x1xf32> to vector<2x1xf32>
    %344 = arith.addf %341, %343 : vector<2x1xf32>
    %cst_142 = arith.constant 0.000000e+00 : f32
    %345 = vector.broadcast %cst_142 : f32 to vector<2x1xf32>
    %346 = arith.subf %345, %344 : vector<2x1xf32>
    %347 = math.exp %346 : vector<2x1xf32>
    %cst_143 = arith.constant 1.000000e+00 : f32
    %348 = vector.broadcast %cst_143 : f32 to vector<2x1xf32>
    %349 = arith.addf %348, %347 : vector<2x1xf32>
    %cst_144 = arith.constant 1.000000e+00 : f32
    %350 = vector.broadcast %cst_144 : f32 to vector<2x1xf32>
    %351 = arith.divf %350, %349 : vector<2x1xf32>
    %c0_145 = arith.constant 0 : index
    %c0_146 = arith.constant 0 : index
    %352 = vector.load %arg16[%c0_145, %c0_146] : memref<2x1xf32, #tpu.memory_space<vmem>>, vector<2x1xf32>
    tpu.vector_store %arg16[%c0_145, %c0_146], %351 {strides = array<i32>} : memref<2x1xf32, #tpu.memory_space<vmem>>, vector<2x1xf32>,
    return
  }
}

</mosaic_0001>

<bundles_post_ra>
// kernel: bert_classifier_forward.1
= control target key start
LH: loop header
LB: loop body
LE: loop exit
PB: predicated region body
PF: predicated region fallthrough
CT: control target
= control target key end

     0   :  { %vm59_vm0 = vcmask 261120   ;;  %vm197_vm1 = vcmask 64512   ;;  %s3990_s25 = smov 88   ;;  %s3991_s26 = smov 96   ;;  %vm281_vm3 = vcmask 130048   ;;  %vm1019_vm4 = vcmask 195584   ;;  %s4733_s0 = inlined_call_operand.vmem [shape: f32[16,32], index: 0, kind: input, shape index: {}]   ;;  %s4734_s6 = inlined_call_operand.vmem [shape: f32[2,32,96], index: 6, kind: input, shape index: {}]   ;;  %s4735_s3 = inlined_call_operand.vmem [shape: f32[15,32], index: 3, kind: input, shape index: {}]   ;;  %s4736_s4 = inlined_call_operand.vmem [shape: f32[2,96], index: 4, kind: input, shape index: {}]   ;;  %s4737_s1 = inlined_call_operand.vmem [shape: f32[16,16], index: 1, kind: input, shape index: {}]   ;;  %s4738_s7 = inlined_call_operand.vmem [shape: f32[2,32,32], index: 7, kind: input, shape index: {}]   ;;  %s4739_s8 = inlined_call_operand.vmem [shape: f32[2,32,64], index: 8, kind: input, shape index: {}]   ;;  %s4740_s9 = inlined_call_operand.vmem [shape: f32[2,64,32], index: 9, kind: input, shape index: {}]   ;;  %s4741_s5 = inlined_call_operand.vmem [shape: f32[2,64], index: 5, kind: input, shape index: {}]   ;;  %s4742_s10 = inlined_call_operand.vmem [shape: f32[32,32], index: 10, kind: input, shape index: {}]   ;;  %s4743_s12 = inlined_call_operand.vmem [shape: f32[5,256], index: 12, kind: input, shape index: {}]   ;;  %s4744_s11 = inlined_call_operand.vmem [shape: f32[32,256], index: 11, kind: input, shape index: {}]   ;;  %s4745_s2 = inlined_call_operand.vmem [shape: f32[2,5], index: 2, kind: input, shape index: {}]   ;;  %s4746_s14 = inlined_call_operand.vmem [shape: f32[256,1], index: 14, kind: input, shape index: {}]   ;;  %s4747_s13 = inlined_call_operand.vmem [shape: f32[1,256], index: 13, kind: input, shape index: {}]   ;;  %s4748_s15 = inlined_call_operand.<no memory space> [shape: f32[1,1], index: 15, kind: input, shape index: {}]   ;;  %s4749_s16 = inlined_call_operand.vmem [shape: f32[2,1], index: 16, kind: output, shape index: {}]  }
   0x1   :  { %4765 = sst [smem:[#allocation3_spill]] %s4733_s0  ;;  %v101_v14 = vld [vmem:[%s4734_s6] sm:$0xff]  ;;  %v102_v15 = vld [vmem:[%s4734_s6 + $0x8] sm:$0xff]  ;;  %v103_v16 = vld [vmem:[%s4734_s6 + $0x10] sm:$0xff]  ;;  %s3992_s27 = smov 120   ;;  %vm1275_vm5 = vcmask 523264  }
   0x2   :  { %s4766_s23 = sld [smem:[#allocation3_spill]]  ;;  %v3585_v17 = vpack.c.bf16 %v102_v15, %v101_v14  ;;  %v104_v18 = vld [vmem:[%s4734_s6 + $0x18] sm:$0xff]  ;;  %v3089_v27 = vld [vmem:[%s4735_s3] ss:$0 sm:$0xff]  ;;  %v3090_v29 = vld [vmem:[%s4735_s3 + $0x1] ss:$0 sm:$0xff] }
   0x3   :  { %v3589_v19 = vpack.c.bf16 %v104_v18, %v103_v16  ;;  %v3091_v36 = vld [vmem:[%s4736_s4] ss:$0 sm:$0xff]  ;;  %vm4151_vm2 = vmpackc.low %vm197_vm1, %vm197_vm1  ;;  %v4170_v53 = vld [vmem:[%s4737_s1 + $0x8] sm:$0xff]  ;;  %s3993_s17 = smov 56   ;;  %s3994_s18 = smov 64   ;;  %vm4005_vm6 = vmmov 0  }
   0x4   :  { %3586 = vmatprep.subr.bf16.mxu0 %v3585_v17  ;;  %v4175_v54 = vld [vmem:[%s4737_s1] sm:$0xff]  ;;  %s4764_s19 = smov 80   ;;  %s4762_s20 = smov 112   ;;  %vm2700_vm7 = vcmask 1040384   ;;  %vm2800_vm8 = vcmask 1044480   ;;  %vm2796_vm9 = vcmask 39936  }
   0x5   :  { %3588 = vmatpush3.bf16.msra.mxu0 %v3585_v17  ;;  %s4759_s21 = smov 48   ;;  %s4757_s22 = smov 104   ;;  %vm3083_vm10 = vcmask 1024  }
   0x6   :  { %3590 = vmatprep.subr.bf16.mxu0 %v3589_v19  ;;  %s4753_s24 = smov 40   ;;  %s4754_s28 = smov 8  }
   0x7   :  { %s4751_s29 = smov 16   ;;  %s4760_s30 = smov 24  }
   0x8   :  { %v55_v0 = vld [vmem:[%s4766_s23] sm:$0xff]  ;;  %v56_v1 = vld [vmem:[%s4766_s23 + $0x8] sm:$0xff]  ;;  %s4756_s23 = smov 72  }
   0x9   :  { %v60_v2 = vsel %vm59_vm0, %v55_v0, 0.0  ;;  %v63_v3 = vsel %vm59_vm0, %v56_v1, 0.0  ;;  %3592 = vmatpush3.bf16.msra.mxu0 %v3589_v19 }
   0xa   :  { %61 = vadd.xlane.f32.xlu0 %v60_v2 }
   0xe   :  { %64 = vadd.xlane.f32.xlu0 %v63_v3 }
  0x97   :  { %v62_v4 = vpop.xlane.xlu0 %61 }
  0x98   :  { %v67_v5 = vmul.f32 0.03125, %v62_v4 }
  0x9a   :  { %v69_v6 = vsub.f32 %v55_v0, %v67_v5 }
  0x9b   :  { %v65_v7 = vpop.xlane.xlu0 %64 }
  0x9c   :  { %v68_v8 = vmul.f32 0.03125, %v65_v7  ;;  %v71_v9 = vmul.f32 %v69_v6, %v69_v6 }
  0x9e   :  { %v70_v10 = vsub.f32 %v56_v1, %v68_v8  ;;  %v73_v11 = vsel %vm59_vm0, %v71_v9, 0.0 }
  0x9f   :  { %74 = vadd.xlane.f32.xlu1 %v73_v11 }
  0xa0   :  { %v72_v12 = vmul.f32 %v70_v10, %v70_v10 }
  0xa2   :  { %v76_v13 = vsel %vm59_vm0, %v72_v12, 0.0 }
  0xa3   :  { %77 = vadd.xlane.f32.xlu1 %v76_v13 }
 0x12c   :  { %v75_v20 = vpop.xlane.xlu1 %74 }
 0x12d   :  { %v79_v21 = vmul.f32 0.03125, %v75_v20 }
 0x12f   :  { %v81_v22 = vadd.f32 1e-12, %v79_v21 }
 0x130   :  { %v78_v23 = vpop.xlane.xlu1 %77 }
 0x131   :  { %3890 = vrsqrt.f32 %v81_v22  ;;  %v80_v24 = vmul.f32 0.03125, %v78_v23 }
 0x133   :  { %v82_v25 = vadd.f32 1e-12, %v80_v24 }
 0x135   :  { %3892 = vrsqrt.f32 %v82_v25 }
 0x13b   :  { %v3891_v26 = vpop.eup %3890 }
 0x13c   :  { %v85_v28 = vmul.f32 %v3891_v26, %v69_v6 }
 0x13e   :  { %v91_v30 = vmul.f32 %v3089_v27, %v85_v28 }
 0x13f   :  { %v3893_v31 = vpop.eup %3892 }
 0x140   :  { %v86_v32 = vmul.f32 %v3893_v31, %v70_v10  ;;  %v4120_v33 = vadd.f32 %v3090_v29, %v91_v30 }
 0x142   :  { %v92_v34 = vmul.f32 %v3089_v27, %v86_v32  ;;  %3366 = vmatprep.mubr.msk.f32.mxu0 %vm59_vm0, %v4120_v33 }
 0x144   :  { %v4124_v35 = vadd.f32 %v3090_v29, %v92_v34 }
 0x146   :  { %3367 = vmatmul.mubr.msk.f32.vlgmr.msra.gmra.mrb[0].mxu0 %vm59_vm0, %v4124_v35 }
 0x219   :  { %v3368_v37 = vpop.f32.mrb[0].mxu0 }
 0x21a   :  { %v4131_v38 = vadd.f32 %v3368_v37, %v3091_v36  ;;  %v182_v39 = vpop.f32.mrb[1].mxu0 }
 0x21b   :  { %v4133_v40 = vadd.f32 %v3091_v36, %v182_v39 }
 0x21d   :  { %3373 = vmatprep.mubr.msk.f32.mxu1 %vm197_vm1, %v4133_v40  ;;  %v4139_v41 = vpack.i.bf16 %v4131_v38, %v4133_v40 }
 0x21f   :  { %3816 = vrot.lane.b32.xlu1 %v4139_v41, %s3990_s25  ;;  %3811 = vrot.lane.b32.xlu0 %v4139_v41, %s3991_s26 }
 0x223   :  { %391 = vrot.lane.b32.xlu1 %v4133_v40, %s3992_s27 }
 0x227   :  { %393 = vrot.lane.b32.xlu1 %v4131_v38, %s3992_s27 }
 0x291   :  { %v3817_v42 = vpop.permute.xlu1 %3816  ;;  %v3812_v43 = vpop.permute.xlu0 %3811 }
 0x292   :  { %v3819_v44 = vunpack.i.h.bf16 %v3817_v42  ;;  %v3818_v45 = vunpack.i.l.bf16 %v3817_v42  ;;  %v3814_v46 = vunpack.i.h.bf16 %v3812_v43  ;;  %v3813_v47 = vunpack.i.l.bf16 %v3812_v43 }
 0x294   :  { %v3593_v49 = vpack.c.bf16 %v3814_v46, %v3813_v47  ;;  %v3603_v50 = vpack.c.bf16 %v3819_v44, %v3818_v45 }
 0x295   :  { %v392_v51 = vpop.permute.xlu1 %391 }
 0x296   :  { %3595 = vmatprep.subr.msk.bf16.mxu1 %vm4151_vm2, %v3593_v49 }
 0x297   :  { %3598 = vmatpush3.bf16.xpose.msk.msra.mxu1 %vm4151_vm2, %v3593_v49 }
 0x298   :  { %3605 = vmatprep.subr.msk.bf16.mxu1 %vm4151_vm2, %v3603_v50 }
 0x299   :  { %v394_v52 = vpop.permute.xlu1 %393 }
 0x29e   :  { %3374 = vmatmul.mubr.msk.f32.vlgmr.msra.gmra.mrb[0].mxu1 %vm197_vm1, %v4131_v38 }
 0x29f   :  { %3608 = vmatpush3.bf16.xpose.msk.msra.mxu1 %vm4151_vm2, %v3603_v50  ;;  %3387 = vmatprep.mubr.msk.f32.mxu1 %vm197_vm1, %v392_v51 }
 0x2a6   :  { %3388 = vmatmul.mubr.msk.f32.vlgmr.msra.gmra.mrb[2].mxu1 %vm197_vm1, %v394_v52 }
 0x371   :  { %v3375_v55 = vpop.f32.mrb[0].mxu1 }
 0x372   :  { %v278_v56 = vadd.f32 %v3375_v55, %v4170_v53  ;;  %v272_v57 = vpop.f32.mrb[1].mxu1 }
 0x373   :  { %v273_v58 = vadd.f32 %v272_v57, %v4175_v54 }
 0x374   :  { %v285_v59 = vsel %vm281_vm3, %v278_v56, -inf }
 0x375   :  { %286 = vmax.xlane.f32.xlu1 %v285_v59  ;;  %v282_v60 = vsel %vm281_vm3, %v273_v58, -inf }
 0x376   :  { %283 = vmax.xlane.f32.xlu0 %v282_v60 }
 0x379   :  { %v3389_v61 = vpop.f32.mrb[2].mxu1 }
 0x37a   :  { %v473_v62 = vpop.f32.mrb[3].mxu1  ;;  %v479_v0 = vadd.f32 %v3389_v61, %v4170_v53 }
 0x37b   :  { %v474_v63 = vadd.f32 %v473_v62, %v4175_v54 }
 0x37c   :  { %v485_v2 = vsel %vm281_vm3, %v479_v0, -inf }
 0x37d   :  { %v482_v1 = vsel %vm281_vm3, %v474_v63, -inf }
 0x37e   :  { %483 = vmax.xlane.f32.xlu0 %v482_v1 }
 0x382   :  { %486 = vmax.xlane.f32.xlu0 %v485_v2 }
 0x402   :  { %v287_v3 = vpop.xlane.xlu1 %286 }
 0x403   :  { %v289_v4 = vsub.f32 %v278_v56, %v287_v3  ;;  %v284_v5 = vpop.xlane.xlu0 %283 }
 0x404   :  { %v288_v6 = vsub.f32 %v273_v58, %v284_v5 }
 0x405   :  { %v292_v7 = vmul.f32 1.442695, %v289_v4 }
 0x406   :  { %v290_v8 = vmul.f32 1.442695, %v288_v6 }
 0x407   :  { %3894 = vpow2.f32 %v292_v7 }
 0x408   :  { %3896 = vpow2.f32 %v290_v8 }
 0x40b   :  { %v484_v9 = vpop.xlane.xlu0 %483 }
 0x40c   :  { %v488_v10 = vsub.f32 %v474_v63, %v484_v9 }
 0x40e   :  { %v490_v11 = vmul.f32 1.442695, %v488_v10 }
 0x40f   :  { %v487_v12 = vpop.xlane.xlu0 %486 }
 0x410   :  { %3898 = vpow2.f32 %v490_v11  ;;  %v489_v13 = vsub.f32 %v479_v0, %v487_v12 }
 0x411   :  { %v3895_v14 = vpop.eup %3894 }
 0x412   :  { %v3897_v15 = vpop.eup %3896  ;;  %v492_v16 = vmul.f32 1.442695, %v489_v13  ;;  %v297_v17 = vsel %vm281_vm3, %v3895_v14, 0.0 }
 0x413   :  { %298 = vadd.xlane.f32.xlu1 %v297_v17  ;;  %v294_v18 = vsel %vm281_vm3, %v3897_v15, 0.0 }
 0x414   :  { %3900 = vpow2.f32 %v492_v16  ;;  %295 = vadd.xlane.f32.xlu0 %v294_v18 }
 0x41a   :  { %v3899_v19 = vpop.eup %3898 }
 0x41b   :  { %v494_v20 = vsel %vm281_vm3, %v3899_v19, 0.0 }
 0x41c   :  { %495 = vadd.xlane.f32.xlu0 %v494_v20 }
 0x41e   :  { %v3901_v21 = vpop.eup %3900 }
 0x41f   :  { %v497_v22 = vsel %vm281_vm3, %v3901_v21, 0.0 }
 0x420   :  { %498 = vadd.xlane.f32.xlu1 %v497_v22 }
 0x431   :  { %3826 = vrot.lane.b32.xlu1 %v4139_v41, %s3993_s17 }
 0x432   :  { %3821 = vrot.lane.b32.xlu0 %v4139_v41, %s3994_s18 }
 0x435   :  { %3831 = vrot.lane.b32.xlu1 %v4139_v41, %s4764_s19  ;;  %s4775_s19 = smov 8  }
 0x436   :  { %593 = vrot.lane.b32.xlu0 %v4131_v38, %s4762_s20 }
 0x439   :  { %591 = vrot.lane.b32.xlu1 %v4133_v40, %s4762_s20  ;;  %s4776_s20 = smov 16  }
 0x4a0   :  { %v299_v24 = vpop.xlane.xlu1 %298 }
 0x4a1   :  { %v296_v23 = vpop.xlane.xlu0 %295 }
 0x4a2   :  { %3902 = vrcp.f32 %v296_v23 }
 0x4a3   :  { %3904 = vrcp.f32 %v299_v24 }
 0x4a9   :  { %v496_v25 = vpop.xlane.xlu0 %495 }
 0x4aa   :  { %3906 = vrcp.f32 %v496_v25 }
 0x4ac   :  { %v3903_v26 = vpop.eup %3902 }
 0x4ad   :  { %v499_v27 = vpop.xlane.xlu1 %498  ;;  %v3822_v28 = vpop.permute.xlu0 %3821  ;;  %v302_v29 = vmul.f32 %v3903_v26, %v3897_v15 }
 0x4ae   :  { %3908 = vrcp.f32 %v499_v27  ;;  %v3824_v30 = vunpack.i.h.bf16 %v3822_v28  ;;  %v3823_v31 = vunpack.i.l.bf16 %v3822_v28  ;;  %v3905_v34 = vpop.eup %3904 }
 0x4af   :  { %3380 = vmatprep.mubr.msk.f32.mxu0 %vm281_vm3, %v302_v29  ;;  %v303_v43 = vmul.f32 %v3905_v34, %v3895_v14 }
 0x4b0   :  { %v3599_v32 = vpack.c.bf16 %v3824_v30, %v3823_v31 }
 0x4b1   :  { %v3827_v36 = vpop.permute.xlu1 %3826  ;;  %v594_v56 = vpop.permute.xlu0 %593 }
 0x4b2   :  { %v3829_v37 = vunpack.i.h.bf16 %v3827_v36  ;;  %v3828_v39 = vunpack.i.l.bf16 %v3827_v36  ;;  %3600 = vmatprep.subr.bf16.mxu0 %v3599_v32 }
 0x4b3   :  { %3602 = vmatpush3.bf16.msra.mxu0 %v3599_v32 }
 0x4b4   :  { %v3907_v42 = vpop.eup %3906  ;;  %v3609_v44 = vpack.c.bf16 %v3829_v37, %v3828_v39 }
 0x4b5   :  { %v3832_v45 = vpop.permute.xlu1 %3831  ;;  %v502_v46 = vmul.f32 %v3907_v42, %v3899_v19 }
 0x4b6   :  { %v3834_v47 = vunpack.i.h.bf16 %v3832_v45  ;;  %v3833_v49 = vunpack.i.l.bf16 %v3832_v45  ;;  %3381 = vmatmul.mubr.msk.f32.vlgmr.msra.gmra.mrb[2].mxu0 %vm281_vm3, %v303_v43  ;;  %3610 = vmatprep.subr.bf16.mxu0 %v3609_v44 }
 0x4b7   :  { %3612 = vmatpush3.bf16.msra.mxu0 %v3609_v44  ;;  %3394 = vmatprep.mubr.msk.f32.mxu0 %vm281_vm3, %v502_v46 }
 0x4b8   :  { %v3909_v50 = vpop.eup %3908  ;;  %v3613_v51 = vpack.c.bf16 %v3834_v47, %v3833_v49 }
 0x4b9   :  { %v503_v52 = vmul.f32 %v3909_v50, %v3901_v21  ;;  %v592_v55 = vpop.permute.xlu1 %591 }
 0x4ba   :  { %3615 = vmatprep.subr.msk.bf16.mxu0 %vm4151_vm2, %v3613_v51 }
 0x4bb   :  { %3395 = vmatmul.mubr.msk.f32.vlgmr.msra.gmra.mrb[4].mxu0 %vm281_vm3, %v503_v52 }
 0x4bc   :  { %3401 = vmatprep.mubr.msk.f32.mxu0 %vm197_vm1, %v592_v55 }
 0x4c0   :  { %3618 = vmatpush3.bf16.xpose.msk.msra.mxu0 %vm4151_vm2, %v3613_v51 }
 0x4c7   :  { %3402 = vmatmul.mubr.msk.f32.vlgmr.msra.gmra.mrb[6].mxu0 %vm197_vm1, %v594_v56 }
 0x589   :  { %v4209_v57 = vpop.f32.mrb[2].mxu0 }
 0x58a   :  { %v4211_v58 = vpop.f32.mrb[3].mxu0 }
 0x58e   :  { %v4213_v59 = vpop.f32.mrb[4].mxu0 }
 0x58f   :  { %v4215_v60 = vpop.f32.mrb[5].mxu0 }
 0x59a   :  { %v3403_v61 = vpop.f32.mrb[6].mxu0 }
 0x59b   :  { %v679_v62 = vadd.f32 %v3403_v61, %v4170_v53  ;;  %v673_v63 = vpop.f32.mrb[7].mxu0 }
 0x59c   :  { %v674_v0 = vadd.f32 %v673_v63, %v4175_v54 }
 0x59d   :  { %v685_v1 = vsel %vm281_vm3, %v679_v62, -inf }
 0x59e   :  { %686 = vmax.xlane.f32.xlu0 %v685_v1  ;;  %v682_v2 = vsel %vm281_vm3, %v674_v0, -inf  ;;  %v1022_v1 = vld [vmem:[%s4738_s7] sm:$0xff] }
 0x59f   :  { %683 = vmax.xlane.f32.xlu1 %v682_v2  ;;  %v1024_v2 = vld [vmem:[%s4738_s7 + $0x10] sm:$0xff] }
 0x5b0   :  { %3836 = vrot.lane.b32.xlu1 %v4139_v41, %s4759_s21 }
 0x5b4   :  { %791 = vrot.lane.b32.xlu1 %v4133_v40, %s4757_s22 }
 0x5b8   :  { %793 = vrot.lane.b32.xlu1 %v4131_v38, %s4757_s22  ;;  %s4771_s22 = smov 48  }
 0x62b   :  { %v687_v3 = vpop.xlane.xlu0 %686 }
 0x62c   :  { %v689_v4 = vsub.f32 %v679_v62, %v687_v3  ;;  %v684_v5 = vpop.xlane.xlu1 %683 }
 0x62d   :  { %v688_v6 = vsub.f32 %v674_v0, %v684_v5 }
 0x62e   :  { %v692_v7 = vmul.f32 1.442695, %v689_v4  ;;  %v1025_v4 = vld [vmem:[%s4738_s7 + $0x18] sm:$0xff] }
 0x62f   :  { %v690_v8 = vmul.f32 1.442695, %v688_v6  ;;  %v3637_v5 = vpack.c.bf16 %v1025_v4, %v1024_v2  ;;  %v1265_v4 = vld [vmem:[%s4740_s9 + $0x18] sm:$0xff] }
 0x630   :  { %3910 = vpow2.f32 %v692_v7  ;;  %v3837_v9 = vpop.permute.xlu1 %3836 }
 0x631   :  { %v3839_v10 = vunpack.i.h.bf16 %v3837_v9  ;;  %v3838_v11 = vunpack.i.l.bf16 %v3837_v9  ;;  %3912 = vpow2.f32 %v690_v8 }
 0x633   :  { %v3619_v12 = vpack.c.bf16 %v3839_v10, %v3838_v11 }
 0x634   :  { %v792_v25 = vpop.permute.xlu1 %791 }
 0x635   :  { %3620 = vmatprep.subr.bf16.mxu1 %v3619_v12 }
 0x636   :  { %3622 = vmatpush3.bf16.msra.mxu1 %v3619_v12 }
 0x638   :  { %v794_v26 = vpop.permute.xlu1 %793 }
 0x63a   :  { %v3911_v13 = vpop.eup %3910 }
 0x63b   :  { %v697_v40 = vsel %vm281_vm3, %v3911_v13, 0.0  ;;  %v3913_v14 = vpop.eup %3912 }
 0x63c   :  { %698 = vadd.xlane.f32.xlu0 %v697_v40  ;;  %v694_v38 = vsel %vm281_vm3, %v3913_v14, 0.0 }
 0x640   :  { %695 = vadd.xlane.f32.xlu0 %v694_v38 }
 0x656   :  { %3841 = vrot.lane.b32.xlu0 %v4139_v41, %s4756_s23  ;;  %s4772_s23 = smov 104  }
 0x6c9   :  { %v699_v15 = vpop.xlane.xlu0 %698 }
 0x6ca   :  { %3914 = vrcp.f32 %v699_v15 }
 0x6cd   :  { %v696_v16 = vpop.xlane.xlu0 %695 }
 0x6ce   :  { %3916 = vrcp.f32 %v696_v16 }
 0x6d1   :  { %v3842_v17 = vpop.permute.xlu0 %3841 }
 0x6d2   :  { %v3844_v18 = vunpack.i.h.bf16 %v3842_v17  ;;  %v3843_v19 = vunpack.i.l.bf16 %v3842_v17 }
 0x6d4   :  { %v3623_v20 = vpack.c.bf16 %v3844_v18, %v3843_v19  ;;  %v3915_v21 = vpop.eup %3914 }
 0x6d5   :  { %v703_v24 = vmul.f32 %v3915_v21, %v3911_v13 }
 0x6d6   :  { %3625 = vmatprep.subr.msk.bf16.mxu1 %vm4151_vm2, %v3623_v20 }
 0x6d8   :  { %v3917_v22 = vpop.eup %3916 }
 0x6d9   :  { %v702_v23 = vmul.f32 %v3917_v22, %v3913_v14 }
 0x6db   :  { %3408 = vmatprep.mubr.msk.f32.mxu1 %vm281_vm3, %v702_v23 }
 0x6dc   :  { %3409 = vmatmul.mubr.msk.f32.vlgmr.msra.gmra.mrb[4].mxu1 %vm281_vm3, %v703_v24 }
 0x6dd   :  { %3628 = vmatpush3.bf16.xpose.msk.msra.mxu1 %vm4151_vm2, %v3623_v20  ;;  %3415 = vmatprep.mubr.msk.f32.mxu1 %vm197_vm1, %v792_v25 }
 0x6e4   :  { %3416 = vmatmul.mubr.msk.f32.vlgmr.msra.gmra.mrb[6].mxu1 %vm197_vm1, %v794_v26 }
 0x7af   :  { %v3410_v27 = vpop.f32.mrb[4].mxu1 }
 0x7b0   :  { %v782_v28 = vpop.f32.mrb[5].mxu1 }
 0x7b7   :  { %v3417_v29 = vpop.f32.mrb[6].mxu1 }
 0x7b8   :  { %v879_v30 = vadd.f32 %v3417_v29, %v4170_v53  ;;  %v873_v31 = vpop.f32.mrb[7].mxu1 }
 0x7b9   :  { %v874_v32 = vadd.f32 %v873_v31, %v4175_v54 }
 0x7ba   :  { %v885_v34 = vsel %vm281_vm3, %v879_v30, -inf }
 0x7bb   :  { %886 = vmax.xlane.f32.xlu0 %v885_v34  ;;  %v882_v36 = vsel %vm281_vm3, %v874_v32, -inf }
 0x7bc   :  { %883 = vmax.xlane.f32.xlu1 %v882_v36  ;;  %v1155_v36 = vld [vmem:[%s4739_s8 + $0x8] sm:$0xff] }
 0x7cd   :  { %3846 = vrot.lane.b32.xlu1 %v4139_v41, %s4753_s24  ;;  %s4774_s24 = smov 40  }
 0x7d1   :  { %995 = vrot.lane.b32.xlu1 %v4213_v59, %s4754_s28 }
 0x7d5   :  { %1001 = vrot.lane.b32.xlu1 %v782_v28, %s4751_s29 }
 0x7d9   :  { %1003 = vrot.lane.b32.xlu1 %v3410_v27, %s4751_s29 }
 0x848   :  { %v887_v37 = vpop.xlane.xlu0 %886 }
 0x849   :  { %v889_v39 = vsub.f32 %v879_v30, %v887_v37  ;;  %v884_v42 = vpop.xlane.xlu1 %883 }
 0x84a   :  { %v888_v43 = vsub.f32 %v874_v32, %v884_v42  ;;  %v1157_v42 = vld [vmem:[%s4739_s8 + $0x18] sm:$0xff] }
 0x84b   :  { %v892_v44 = vmul.f32 1.442695, %v889_v39  ;;  %v1156_v39 = vld [vmem:[%s4739_s8 + $0x10] sm:$0xff] }
 0x84c   :  { %v890_v45 = vmul.f32 1.442695, %v888_v43  ;;  %v3645_v43 = vpack.c.bf16 %v1157_v42, %v1156_v39 }
 0x84d   :  { %v3847_v46 = vpop.permute.xlu1 %3846 }
 0x84e   :  { %3918 = vpow2.f32 %v890_v45  ;;  %v3849_v47 = vunpack.i.h.bf16 %v3847_v46  ;;  %v3848_v49 = vunpack.i.l.bf16 %v3847_v46 }
 0x84f   :  { %3920 = vpow2.f32 %v892_v44 }
 0x850   :  { %v3629_v41 = vpack.c.bf16 %v3849_v47, %v3848_v49 }
 0x851   :  { %v996_v8 = vpop.permute.xlu1 %995 }
 0x852   :  { %3630 = vmatprep.subr.bf16.mxu0 %v3629_v41  ;;  %v1016_v40 = vsel %vm197_vm1, %v4209_v57, %v996_v8 }
 0x853   :  { %3632 = vmatpush3.bf16.msra.mxu0 %v3629_v41 }
 0x855   :  { %v1002_v9 = vpop.permute.xlu1 %1001 }
 0x858   :  { %v3919_v50 = vpop.eup %3918 }
 0x859   :  { %v894_v51 = vsel %vm281_vm3, %v3919_v50, 0.0  ;;  %v3921_v52 = vpop.eup %3920  ;;  %v1004_v11 = vpop.permute.xlu1 %1003 }
 0x85a   :  { %895 = vadd.xlane.f32.xlu0 %v894_v51  ;;  %v897_v55 = vsel %vm281_vm3, %v3921_v52, 0.0  ;;  %v1018_v15 = vsel %vm281_vm3, %v1016_v40, %v1004_v11  ;;  %v3121_v51 = vld [vmem:[%s4735_s3 + $0x3] ss:$0 sm:$0xff] }
 0x85e   :  { %898 = vadd.xlane.f32.xlu0 %v897_v55  ;;  %v3122_v55 = vld [vmem:[%s4735_s3 + $0x4] ss:$0 sm:$0xff] }
 0x874   :  { %993 = vrot.lane.b32.xlu0 %v4215_v60, %s4754_s28  ;;  %v1023_v60 = vld [vmem:[%s4738_s7 + $0x8] sm:$0xff] }
 0x875   :  { %v3633_v3 = vpack.c.bf16 %v1023_v60, %v1022_v1  ;;  %v1262_v1 = vld [vmem:[%s4740_s9] sm:$0xff]  ;;  %v1263_v60 = vld [vmem:[%s4740_s9 + $0x8] sm:$0xff] }
 0x876   :  { %v3649_v2 = vpack.c.bf16 %v1263_v60, %v1262_v1 }
 0x877   :  { %3634 = vmatprep.subr.bf16.mxu0 %v3633_v3 }
 0x8e7   :  { %v896_v56 = vpop.xlane.xlu0 %895 }
 0x8e8   :  { %3922 = vrcp.f32 %v896_v56 }
 0x8eb   :  { %v899_v59 = vpop.xlane.xlu0 %898 }
 0x8ec   :  { %3924 = vrcp.f32 %v899_v59 }
 0x8ef   :  { %v994_v10 = vpop.permute.xlu0 %993 }
 0x8f0   :  { %v1015_v12 = vsel %vm197_vm1, %v4211_v58, %v994_v10  ;;  %v3118_v58 = vld [vmem:[%s4735_s3 + $0x2] ss:$0 sm:$0xff]  ;;  %v1269_v10 = vld [vmem:[%s4740_s9 + $0x38] sm:$0xff] }
 0x8f1   :  { %v1017_v14 = vsel %vm281_vm3, %v1015_v12, %v1002_v9  ;;  %v1268_v9 = vld [vmem:[%s4740_s9 + $0x30] sm:$0xff]  ;;  %v3123_v12 = vld [vmem:[%s4741_s5] ss:$0 sm:$0xff] }
 0x8f2   :  { %v3923_v61 = vpop.eup %3922  ;;  %v3661_v11 = vpack.c.bf16 %v1269_v10, %v1268_v9  ;;  %v3130_v10 = vld [vmem:[%s4735_s3 + $0x7] ss:$0 sm:$0xff] }
 0x8f3   :  { %v902_v62 = vmul.f32 %v3923_v61, %v3919_v50 }
 0x8f5   :  { %3422 = vmatprep.mubr.msk.f32.mxu0 %vm281_vm3, %v902_v62 }
 0x8f6   :  { %v3925_v63 = vpop.eup %3924 }
 0x8f7   :  { %v903_v0 = vmul.f32 %v3925_v63, %v3921_v52 }
 0x8f9   :  { %3423 = vmatmul.mubr.msk.f32.vlgmr.msra.gmra.mrb[8].mxu0 %vm281_vm3, %v903_v0 }
 0x8fa   :  { %3636 = vmatpush3.bf16.msra.mxu0 %v3633_v3  ;;  %v1264_v3 = vld [vmem:[%s4740_s9 + $0x10] sm:$0xff] }
 0x8fb   :  { %3638 = vmatprep.subr.bf16.mxu0 %v3637_v5 }
 0x8fe   :  { %3640 = vmatpush3.bf16.msra.mxu0 %v3637_v5  ;;  %v1266_v5 = vld [vmem:[%s4740_s9 + $0x20] sm:$0xff] }
 0x9cc   :  { %v3424_v6 = vpop.f32.mrb[8].mxu0 }
 0x9cd   :  { %1011 = vrot.lane.b32.xlu1 %v3424_v6, %s4760_s30  ;;  %v982_v7 = vpop.f32.mrb[9].mxu0  ;;  %v3653_v6 = vpack.c.bf16 %v1265_v4, %v1264_v3 }
 0x9ce   :  { %1009 = vrot.lane.b32.xlu0 %v982_v7, %s4760_s30  ;;  %v1267_v7 = vld [vmem:[%s4740_s9 + $0x28] sm:$0xff] }
 0x9cf   :  { %v3657_v8 = vpack.c.bf16 %v1267_v7, %v1266_v5 }
 0xa3f   :  { %v1012_v13 = vpop.permute.xlu1 %1011 }
 0xa40   :  { %v1010_v38 = vpop.permute.xlu0 %1009  ;;  %v1021_v17 = vsel %vm1019_vm4, %v1018_v15, %v1012_v13 }
 0xa41   :  { %v1020_v16 = vsel %vm1019_vm4, %v1017_v14, %v1010_v38 }
 0xa42   :  { %3433 = vmatprep.mubr.msk.f32.mxu0 %vm59_vm0, %v1020_v16 }
 0xa43   :  { %3434 = vmatmul.mubr.msk.f32.vlgmr.msra.gmra.mrb[10].mxu0 %vm59_vm0, %v1021_v17 }
 0xb16   :  { %v3435_v18 = vpop.f32.mrb[10].mxu0 }
 0xb17   :  { %v1109_v19 = vadd.f32 %v3435_v18, %v3118_v58  ;;  %v1103_v57 = vpop.f32.mrb[11].mxu0 }
 0xb18   :  { %v1104_v20 = vadd.f32 %v3118_v58, %v1103_v57 }
 0xb19   :  { %v1113_v21 = vadd.f32 %v1109_v19, %v4124_v35 }
 0xb1a   :  { %v1112_v22 = vadd.f32 %v1104_v20, %v4120_v33  ;;  %v1154_v33 = vld [vmem:[%s4739_s8] sm:$0xff] }
 0xb1b   :  { %v1119_v23 = vsel %vm59_vm0, %v1113_v21, 0.0  ;;  %v3641_v37 = vpack.c.bf16 %v1155_v36, %v1154_v33 }
 0xb1c   :  { %1120 = vadd.xlane.f32.xlu1 %v1119_v23  ;;  %v1116_v24 = vsel %vm59_vm0, %v1112_v22, 0.0 }
 0xb1d   :  { %1117 = vadd.xlane.f32.xlu0 %v1116_v24  ;;  %3642 = vmatprep.subr.bf16.mxu1 %v3641_v37 }
 0xb1e   :  { %3644 = vmatpush3.bf16.msra.mxu1 %v3641_v37 }
 0xb1f   :  { %3646 = vmatprep.subr.bf16.mxu1 %v3645_v43 }
 0xb22   :  { %3648 = vmatpush3.bf16.msra.mxu1 %v3645_v43 }
 0xb23   :  { %3650 = vmatprep.subr.bf16.mxu1 %v3649_v2 }
 0xba9   :  { %v1121_v25 = vpop.xlane.xlu1 %1120 }
 0xbaa   :  { %v1123_v26 = vmul.f32 0.03125, %v1121_v25  ;;  %v1118_v27 = vpop.xlane.xlu0 %1117 }
 0xbab   :  { %v1122_v28 = vmul.f32 0.03125, %v1118_v27 }
 0xbac   :  { %v1125_v29 = vsub.f32 %v1113_v21, %v1123_v26 }
 0xbad   :  { %v1124_v30 = vsub.f32 %v1112_v22, %v1122_v28 }
 0xbae   :  { %v1127_v34 = vmul.f32 %v1125_v29, %v1125_v29 }
 0xbaf   :  { %v1126_v31 = vmul.f32 %v1124_v30, %v1124_v30 }
 0xbb0   :  { %v1131_v35 = vsel %vm59_vm0, %v1127_v34, 0.0 }
 0xbb1   :  { %v1128_v32 = vsel %vm59_vm0, %v1126_v31, 0.0  ;;  %v3126_v31 = vld [vmem:[%s4735_s3 + $0x5] ss:$0 sm:$0xff] }
 0xbb2   :  { %1129 = vadd.xlane.f32.xlu0 %v1128_v32 }
 0xbb6   :  { %1132 = vadd.xlane.f32.xlu0 %v1131_v35 }
 0xc3f   :  { %v1130_v44 = vpop.xlane.xlu0 %1129 }
 0xc40   :  { %v1134_v45 = vmul.f32 0.03125, %v1130_v44 }
 0xc42   :  { %v1136_v46 = vadd.f32 1e-12, %v1134_v45 }
 0xc43   :  { %v1133_v47 = vpop.xlane.xlu0 %1132 }
 0xc44   :  { %3926 = vrsqrt.f32 %v1136_v46  ;;  %v1135_v49 = vmul.f32 0.03125, %v1133_v47 }
 0xc46   :  { %v1137_v41 = vadd.f32 1e-12, %v1135_v49 }
 0xc48   :  { %3928 = vrsqrt.f32 %v1137_v41 }
 0xc4e   :  { %v3927_v50 = vpop.eup %3926 }
 0xc4f   :  { %v1140_v52 = vmul.f32 %v3927_v50, %v1124_v30 }
 0xc51   :  { %v1146_v56 = vmul.f32 %v3121_v51, %v1140_v52 }
 0xc52   :  { %v3929_v59 = vpop.eup %3928 }
 0xc53   :  { %v1141_v61 = vmul.f32 %v3929_v59, %v1125_v29  ;;  %v1152_v62 = vadd.f32 %v3122_v55, %v1146_v56  ;;  %v3132_v56 = vld [vmem:[%s4734_s6 + $0x28] sm:$0xff] }
 0xc55   :  { %v1147_v63 = vmul.f32 %v3121_v51, %v1141_v61  ;;  %3444 = vmatprep.mubr.msk.f32.mxu1 %vm59_vm0, %v1152_v62  ;;  %v3133_v61 = vld [vmem:[%s4734_s6 + $0x30] sm:$0xff] }
 0xc57   :  { %v1153_v0 = vadd.f32 %v3122_v55, %v1147_v63  ;;  %v3131_v55 = vld [vmem:[%s4734_s6 + $0x20] sm:$0xff] }
 0xc58   :  { %v3665_v59 = vpack.c.bf16 %v3132_v56, %v3131_v55 }
 0xc59   :  { %3445 = vmatmul.mubr.msk.f32.vlgmr.msra.gmra.mrb[8].mxu1 %vm59_vm0, %v1153_v0 }
 0xc5a   :  { %3652 = vmatpush3.bf16.msra.mxu1 %v3649_v2 }
 0xc5b   :  { %3654 = vmatprep.subr.bf16.mxu1 %v3653_v6 }
 0xc5e   :  { %3656 = vmatpush3.bf16.msra.mxu1 %v3653_v6  ;;  %v3129_v6 = vld [vmem:[%s4735_s3 + $0x6] ss:$0 sm:$0xff] }
 0xc5f   :  { %3658 = vmatprep.subr.bf16.mxu1 %v3657_v8 }
 0xc62   :  { %3660 = vmatpush3.bf16.msra.mxu1 %v3657_v8 }
 0xc63   :  { %3662 = vmatprep.subr.bf16.mxu1 %v3661_v11 }
 0xc66   :  { %3664 = vmatpush3.bf16.msra.mxu1 %v3661_v11 }
 0xc67   :  { %3666 = vmatprep.subr.bf16.mxu1 %v3665_v59 }
 0xd2c   :  { %v3446_v13 = vpop.f32.mrb[8].mxu1 }
 0xd2d   :  { %v1241_v40 = vadd.f32 %v3446_v13, %v3123_v12  ;;  %v1235_v14 = vpop.f32.mrb[9].mxu1 }
 0xd2e   :  { %v1236_v38 = vadd.f32 %v3123_v12, %v1235_v14  ;;  %v3135_v14 = vld [vmem:[%s4736_s4 + $0x1] ss:$0 sm:$0xff]  ;;  %s4769_s4 = smov 80  }
 0xd2f   :  { %v1247_v15 = vmul.f32 0.044715, %v1241_v40  ;;  %v1245_v28 = vmul.f32 0.5, %v1241_v40 }
 0xd30   :  { %v1246_v16 = vmul.f32 0.044715, %v1236_v38  ;;  %v1244_v26 = vmul.f32 0.5, %v1236_v38 }
 0xd31   :  { %v1249_v17 = vmul.f32 %v1247_v15, %v1241_v40 }
 0xd32   :  { %v1248_v58 = vmul.f32 %v1246_v16, %v1236_v38 }
 0xd33   :  { %v1251_v18 = vmul.f32 %v1249_v17, %v1241_v40 }
 0xd34   :  { %v1250_v19 = vmul.f32 %v1248_v58, %v1236_v38 }
 0xd35   :  { %v1253_v57 = vadd.f32 %v1251_v18, %v1241_v40 }
 0xd36   :  { %v1252_v20 = vadd.f32 %v1250_v19, %v1236_v38 }
 0xd37   :  { %v1255_v21 = vmul.f32 0.7978846, %v1253_v57 }
 0xd38   :  { %v1254_v22 = vmul.f32 0.7978846, %v1252_v20 }
 0xd39   :  { %3930 = vtanh.f32 %v1255_v21 }
 0xd3a   :  { %3932 = vtanh.f32 %v1254_v22 }
 0xd43   :  { %v3931_v23 = vpop.eup %3930 }
 0xd44   :  { %v3933_v24 = vpop.eup %3932  ;;  %v1259_v25 = vadd.f32 1.0, %v3931_v23 }
 0xd45   :  { %v1258_v27 = vadd.f32 1.0, %v3933_v24 }
 0xd46   :  { %v1261_v30 = vmul.f32 %v1259_v25, %v1245_v28 }
 0xd47   :  { %v1260_v29 = vmul.f32 %v1258_v27, %v1244_v26 }
 0xd49   :  { %3463 = vmatprep.mubr.msk.f32.mxu1 %vm1275_vm5, %v1260_v29 }
 0xd4a   :  { %3464 = vmatmul.mubr.msk.f32.vlgmr.msra.gmra.mrb[10].mxu1 %vm1275_vm5, %v1261_v30 }
 0xd4b   :  { %3668 = vmatpush3.bf16.msra.mxu1 %v3665_v59 }
 0xe1d   :  { %v3465_v32 = vpop.f32.mrb[10].mxu1 }
 0xe1e   :  { %v1354_v34 = vadd.f32 %v3465_v32, %v3126_v31  ;;  %v1348_v35 = vpop.f32.mrb[11].mxu1 }
 0xe1f   :  { %v1349_v33 = vadd.f32 %v3126_v31, %v1348_v35 }
 0xe20   :  { %v1358_v36 = vadd.f32 %v1354_v34, %v1153_v0 }
 0xe21   :  { %v1357_v37 = vadd.f32 %v1349_v33, %v1152_v62  ;;  %v3134_v62 = vld [vmem:[%s4734_s6 + $0x38] sm:$0xff] }
 0xe22   :  { %v1364_v39 = vsel %vm59_vm0, %v1358_v36, 0.0  ;;  %v3669_v63 = vpack.c.bf16 %v3134_v62, %v3133_v61 }
 0xe23   :  { %1365 = vadd.xlane.f32.xlu1 %v1364_v39  ;;  %v1361_v42 = vsel %vm59_vm0, %v1357_v37, 0.0 }
 0xe24   :  { %1362 = vadd.xlane.f32.xlu0 %v1361_v42  ;;  %3670 = vmatprep.subr.bf16.mxu1 %v3669_v63 }
 0xe25   :  { %3672 = vmatpush3.bf16.msra.mxu1 %v3669_v63 }
 0xeb0   :  { %v1366_v43 = vpop.xlane.xlu1 %1365 }
 0xeb1   :  { %v1368_v44 = vmul.f32 0.03125, %v1366_v43  ;;  %v1363_v45 = vpop.xlane.xlu0 %1362 }
 0xeb2   :  { %v1367_v46 = vmul.f32 0.03125, %v1363_v45 }
 0xeb3   :  { %v1370_v47 = vsub.f32 %v1358_v36, %v1368_v44 }
 0xeb4   :  { %v1369_v49 = vsub.f32 %v1357_v37, %v1367_v46 }
 0xeb5   :  { %v1372_v41 = vmul.f32 %v1370_v47, %v1370_v47 }
 0xeb6   :  { %v1371_v50 = vmul.f32 %v1369_v49, %v1369_v49 }
 0xeb7   :  { %v1376_v51 = vsel %vm59_vm0, %v1372_v41, 0.0 }
 0xeb8   :  { %1377 = vadd.xlane.f32.xlu1 %v1376_v51  ;;  %v1373_v52 = vsel %vm59_vm0, %v1371_v50, 0.0 }
 0xeb9   :  { %1374 = vadd.xlane.f32.xlu0 %v1373_v52 }
 0xf45   :  { %v1378_v0 = vpop.xlane.xlu1 %1377 }
 0xf46   :  { %v1380_v1 = vmul.f32 0.03125, %v1378_v0  ;;  %v1375_v60 = vpop.xlane.xlu0 %1374 }
 0xf47   :  { %v1379_v2 = vmul.f32 0.03125, %v1375_v60 }
 0xf48   :  { %v1382_v3 = vadd.f32 1e-12, %v1380_v1 }
 0xf49   :  { %v1381_v4 = vadd.f32 1e-12, %v1379_v2 }
 0xf4a   :  { %3934 = vrsqrt.f32 %v1382_v3 }
 0xf4b   :  { %3936 = vrsqrt.f32 %v1381_v4 }
 0xf54   :  { %v3935_v5 = vpop.eup %3934 }
 0xf55   :  { %v3937_v7 = vpop.eup %3936  ;;  %v1386_v8 = vmul.f32 %v3935_v5, %v1370_v47 }
 0xf56   :  { %v1385_v9 = vmul.f32 %v3937_v7, %v1369_v49 }
 0xf57   :  { %v1392_v11 = vmul.f32 %v3129_v6, %v1386_v8 }
 0xf58   :  { %v1391_v12 = vmul.f32 %v3129_v6, %v1385_v9 }
 0xf59   :  { %v4364_v40 = vadd.f32 %v3130_v10, %v1392_v11 }
 0xf5a   :  { %v4362_v13 = vadd.f32 %v3130_v10, %v1391_v12 }
 0xf5c   :  { %3474 = vmatprep.mubr.msk.f32.mxu1 %vm59_vm0, %v4362_v13 }
 0xf5d   :  { %3475 = vmatmul.mubr.msk.f32.vlgmr.msra.gmra.mrb[12].mxu1 %vm59_vm0, %v4364_v40 }
0x1030   :  { %v3476_v38 = vpop.f32.mrb[12].mxu1 }
0x1031   :  { %v4373_v15 = vadd.f32 %v3476_v38, %v3135_v14  ;;  %v1481_v16 = vpop.f32.mrb[13].mxu1 }
0x1032   :  { %v4375_v17 = vadd.f32 %v3135_v14, %v1481_v16 }
0x1034   :  { %3481 = vmatprep.mubr.msk.f32.mxu1 %vm197_vm1, %v4375_v17  ;;  %v4381_v58 = vpack.i.bf16 %v4373_v15, %v4375_v17 }
0x1036   :  { %3856 = vrot.lane.b32.xlu1 %v4381_v58, %s3990_s25  ;;  %3851 = vrot.lane.b32.xlu0 %v4381_v58, %s3991_s26  ;;  %s4770_s25 = smov 112   ;;  %s4777_s26 = smov 24  }
0x103a   :  { %1688 = vrot.lane.b32.xlu1 %v4375_v17, %s3992_s27 }
0x103e   :  { %1690 = vrot.lane.b32.xlu1 %v4373_v15, %s3992_s27 }
0x10a8   :  { %v3857_v18 = vpop.permute.xlu1 %3856  ;;  %v3852_v19 = vpop.permute.xlu0 %3851 }
0x10a9   :  { %v3859_v57 = vunpack.i.h.bf16 %v3857_v18  ;;  %v3858_v20 = vunpack.i.l.bf16 %v3857_v18  ;;  %v3854_v21 = vunpack.i.h.bf16 %v3852_v19  ;;  %v3853_v22 = vunpack.i.l.bf16 %v3852_v19 }
0x10ab   :  { %v3673_v23 = vpack.c.bf16 %v3854_v21, %v3853_v22  ;;  %v3683_v24 = vpack.c.bf16 %v3859_v57, %v3858_v20 }
0x10ac   :  { %v1689_v25 = vpop.permute.xlu1 %1688 }
0x10ad   :  { %3675 = vmatprep.subr.msk.bf16.mxu1 %vm4151_vm2, %v3673_v23 }
0x10ae   :  { %3678 = vmatpush3.bf16.xpose.msk.msra.mxu1 %vm4151_vm2, %v3673_v23 }
0x10af   :  { %3685 = vmatprep.subr.msk.bf16.mxu1 %vm4151_vm2, %v3683_v24 }
0x10b0   :  { %v1691_v26 = vpop.permute.xlu1 %1690 }
0x10b5   :  { %3482 = vmatmul.mubr.msk.f32.vlgmr.msra.gmra.mrb[14].mxu1 %vm197_vm1, %v4373_v15 }
0x10b6   :  { %3688 = vmatpush3.bf16.xpose.msk.msra.mxu1 %vm4151_vm2, %v3683_v24  ;;  %3495 = vmatprep.mubr.msk.f32.mxu1 %vm197_vm1, %v1689_v25 }
0x10bd   :  { %3496 = vmatmul.mubr.msk.f32.vlgmr.msra.gmra.mrb[16].mxu1 %vm197_vm1, %v1691_v26 }
0x1188   :  { %v3483_v27 = vpop.f32.mrb[14].mxu1 }
0x1189   :  { %v1576_v28 = vadd.f32 %v3483_v27, %v4170_v53  ;;  %v1570_v29 = vpop.f32.mrb[15].mxu1 }
0x118a   :  { %v1571_v30 = vadd.f32 %v1570_v29, %v4175_v54 }
0x118b   :  { %v1582_v31 = vsel %vm281_vm3, %v1576_v28, -inf }
0x118c   :  { %1583 = vmax.xlane.f32.xlu1 %v1582_v31  ;;  %v1579_v32 = vsel %vm281_vm3, %v1571_v30, -inf }
0x118d   :  { %1580 = vmax.xlane.f32.xlu0 %v1579_v32  ;;  %v3988_v32 = vld [vmem:[%s4737_s1 + $0x8] sm:$0xff] }
0x1190   :  { %v3497_v34 = vpop.f32.mrb[16].mxu1 }
0x1191   :  { %v1770_v35 = vpop.f32.mrb[17].mxu1  ;;  %v1776_v36 = vadd.f32 %v3497_v34, %v4170_v53 }
0x1192   :  { %v1771_v33 = vadd.f32 %v1770_v35, %v4175_v54 }
0x1193   :  { %v1782_v39 = vsel %vm281_vm3, %v1776_v36, -inf }
0x1194   :  { %v1779_v37 = vsel %vm281_vm3, %v1771_v33, -inf }
0x1195   :  { %1780 = vmax.xlane.f32.xlu0 %v1779_v37 }
0x1199   :  { %1783 = vmax.xlane.f32.xlu0 %v1782_v39 }
0x1219   :  { %v1584_v42 = vpop.xlane.xlu1 %1583 }
0x121a   :  { %v1586_v43 = vsub.f32 %v1576_v28, %v1584_v42  ;;  %v1581_v44 = vpop.xlane.xlu0 %1580 }
0x121b   :  { %v1585_v45 = vsub.f32 %v1571_v30, %v1581_v44 }
0x121c   :  { %v1589_v46 = vmul.f32 1.442695, %v1586_v43 }
0x121d   :  { %v1587_v47 = vmul.f32 1.442695, %v1585_v45 }
0x121e   :  { %3938 = vpow2.f32 %v1589_v46 }
0x121f   :  { %3940 = vpow2.f32 %v1587_v47 }
0x1222   :  { %v1781_v49 = vpop.xlane.xlu0 %1780 }
0x1223   :  { %v1785_v41 = vsub.f32 %v1771_v33, %v1781_v49  ;;  %v3989_v33 = vld [vmem:[%s4737_s1] sm:$0xff]  ;;  %s4773_s1 = smov 72  }
0x1225   :  { %v1787_v50 = vmul.f32 1.442695, %v1785_v41 }
0x1226   :  { %v1784_v54 = vpop.xlane.xlu0 %1783 }
0x1227   :  { %3942 = vpow2.f32 %v1787_v50  ;;  %v1786_v53 = vsub.f32 %v1776_v36, %v1784_v54 }
0x1228   :  { %v3939_v51 = vpop.eup %3938 }
0x1229   :  { %v3941_v52 = vpop.eup %3940  ;;  %v1789_v55 = vmul.f32 1.442695, %v1786_v53  ;;  %v1594_v56 = vsel %vm281_vm3, %v3939_v51, 0.0 }
0x122a   :  { %1595 = vadd.xlane.f32.xlu1 %v1594_v56  ;;  %v1591_v59 = vsel %vm281_vm3, %v3941_v52, 0.0 }
0x122b   :  { %3944 = vpow2.f32 %v1789_v55  ;;  %1592 = vadd.xlane.f32.xlu0 %v1591_v59 }
0x1231   :  { %v3943_v61 = vpop.eup %3942 }
0x1232   :  { %v1791_v62 = vsel %vm281_vm3, %v3943_v61, 0.0 }
0x1233   :  { %1792 = vadd.xlane.f32.xlu0 %v1791_v62 }
0x1235   :  { %v3945_v63 = vpop.eup %3944 }
0x1236   :  { %v1794_v0 = vsel %vm281_vm3, %v3945_v63, 0.0 }
0x1237   :  { %1795 = vadd.xlane.f32.xlu1 %v1794_v0 }
0x1248   :  { %3866 = vrot.lane.b32.xlu1 %v4381_v58, %s3993_s17 }
0x1249   :  { %3861 = vrot.lane.b32.xlu0 %v4381_v58, %s3994_s18 }
0x124c   :  { %3871 = vrot.lane.b32.xlu1 %v4381_v58, %s4769_s4 }
0x124d   :  { %1890 = vrot.lane.b32.xlu0 %v4373_v15, %s4770_s25 }
0x1250   :  { %1888 = vrot.lane.b32.xlu1 %v4375_v17, %s4770_s25 }
0x12b7   :  { %v1596_v60 = vpop.xlane.xlu1 %1595 }
0x12b8   :  { %v1593_v1 = vpop.xlane.xlu0 %1592 }
0x12b9   :  { %3946 = vrcp.f32 %v1593_v1 }
0x12ba   :  { %3948 = vrcp.f32 %v1596_v60 }
0x12c0   :  { %v1793_v2 = vpop.xlane.xlu0 %1792 }
0x12c1   :  { %3950 = vrcp.f32 %v1793_v2 }
0x12c3   :  { %v3947_v3 = vpop.eup %3946 }
0x12c4   :  { %v1796_v4 = vpop.xlane.xlu1 %1795  ;;  %v3862_v5 = vpop.permute.xlu0 %3861  ;;  %v1599_v6 = vmul.f32 %v3947_v3, %v3941_v52 }
0x12c5   :  { %3952 = vrcp.f32 %v1796_v4  ;;  %v3864_v7 = vunpack.i.h.bf16 %v3862_v5  ;;  %v3863_v8 = vunpack.i.l.bf16 %v3862_v5  ;;  %v3949_v10 = vpop.eup %3948 }
0x12c6   :  { %3488 = vmatprep.mubr.msk.f32.mxu0 %vm281_vm3, %v1599_v6  ;;  %v1600_v16 = vmul.f32 %v3949_v10, %v3939_v51 }
0x12c7   :  { %v3679_v9 = vpack.c.bf16 %v3864_v7, %v3863_v8 }
0x12c8   :  { %v3867_v11 = vpop.permute.xlu1 %3866  ;;  %v1891_v26 = vpop.permute.xlu0 %1890 }
0x12c9   :  { %v3869_v12 = vunpack.i.h.bf16 %v3867_v11  ;;  %v3868_v14 = vunpack.i.l.bf16 %v3867_v11  ;;  %3680 = vmatprep.subr.bf16.mxu0 %v3679_v9 }
0x12ca   :  { %3682 = vmatpush3.bf16.msra.mxu0 %v3679_v9 }
0x12cb   :  { %v3951_v38 = vpop.eup %3950  ;;  %v3689_v18 = vpack.c.bf16 %v3869_v12, %v3868_v14 }
0x12cc   :  { %v3872_v19 = vpop.permute.xlu1 %3871  ;;  %v1799_v57 = vmul.f32 %v3951_v38, %v3943_v61 }
0x12cd   :  { %v3874_v20 = vunpack.i.h.bf16 %v3872_v19  ;;  %v3873_v21 = vunpack.i.l.bf16 %v3872_v19  ;;  %3489 = vmatmul.mubr.msk.f32.vlgmr.msra.gmra.mrb[12].mxu0 %vm281_vm3, %v1600_v16  ;;  %3690 = vmatprep.subr.bf16.mxu0 %v3689_v18 }
0x12ce   :  { %3692 = vmatpush3.bf16.msra.mxu0 %v3689_v18  ;;  %3502 = vmatprep.mubr.msk.f32.mxu0 %vm281_vm3, %v1799_v57 }
0x12cf   :  { %v3953_v22 = vpop.eup %3952  ;;  %v3693_v23 = vpack.c.bf16 %v3874_v20, %v3873_v21 }
0x12d0   :  { %v1800_v24 = vmul.f32 %v3953_v22, %v3945_v63  ;;  %v1889_v25 = vpop.permute.xlu1 %1888 }
0x12d1   :  { %3695 = vmatprep.subr.msk.bf16.mxu0 %vm4151_vm2, %v3693_v23 }
0x12d2   :  { %3503 = vmatmul.mubr.msk.f32.vlgmr.msra.gmra.mrb[14].mxu0 %vm281_vm3, %v1800_v24 }
0x12d3   :  { %3509 = vmatprep.mubr.msk.f32.mxu0 %vm197_vm1, %v1889_v25 }
0x12d7   :  { %3698 = vmatpush3.bf16.xpose.msk.msra.mxu0 %vm4151_vm2, %v3693_v23 }
0x12de   :  { %3510 = vmatmul.mubr.msk.f32.vlgmr.msra.gmra.mrb[16].mxu0 %vm197_vm1, %v1891_v26 }
0x13a0   :  { %v4435_v27 = vpop.f32.mrb[12].mxu0 }
0x13a1   :  { %v4437_v28 = vpop.f32.mrb[13].mxu0 }
0x13a5   :  { %v4439_v29 = vpop.f32.mrb[14].mxu0 }
0x13a6   :  { %v4441_v30 = vpop.f32.mrb[15].mxu0 }
0x13b1   :  { %v3511_v31 = vpop.f32.mrb[16].mxu0 }
0x13b2   :  { %v1976_v34 = vadd.f32 %v3988_v32, %v3511_v31  ;;  %v1970_v35 = vpop.f32.mrb[17].mxu0 }
0x13b3   :  { %v1971_v36 = vadd.f32 %v3989_v33, %v1970_v35  ;;  %v3162_v35 = vld [vmem:[%s4738_s7 + $0x20] sm:$0xff] }
0x13b4   :  { %v1982_v37 = vsel %vm281_vm3, %v1976_v34, -inf }
0x13b5   :  { %1983 = vmax.xlane.f32.xlu0 %v1982_v37  ;;  %v1979_v39 = vsel %vm281_vm3, %v1971_v36, -inf  ;;  %v3165_v37 = vld [vmem:[%s4738_s7 + $0x38] sm:$0xff] }
0x13b6   :  { %1980 = vmax.xlane.f32.xlu1 %v1979_v39 }
0x13c7   :  { %3876 = vrot.lane.b32.xlu1 %v4381_v58, %s4771_s22 }
0x13cb   :  { %2088 = vrot.lane.b32.xlu1 %v4375_v17, %s4772_s23 }
0x13cf   :  { %2090 = vrot.lane.b32.xlu1 %v4373_v15, %s4772_s23 }
0x1442   :  { %v1984_v42 = vpop.xlane.xlu0 %1983 }
0x1443   :  { %v1986_v43 = vsub.f32 %v1976_v34, %v1984_v42  ;;  %v1981_v44 = vpop.xlane.xlu1 %1980 }
0x1444   :  { %v1985_v45 = vsub.f32 %v1971_v36, %v1981_v44 }
0x1445   :  { %v1989_v46 = vmul.f32 1.442695, %v1986_v43 }
0x1446   :  { %v1987_v47 = vmul.f32 1.442695, %v1985_v45 }
0x1447   :  { %3954 = vpow2.f32 %v1989_v46  ;;  %v3877_v49 = vpop.permute.xlu1 %3876 }
0x1448   :  { %v3879_v41 = vunpack.i.h.bf16 %v3877_v49  ;;  %v3878_v50 = vunpack.i.l.bf16 %v3877_v49  ;;  %3956 = vpow2.f32 %v1987_v47 }
0x144a   :  { %v3699_v54 = vpack.c.bf16 %v3879_v41, %v3878_v50 }
0x144b   :  { %v2089_v2 = vpop.permute.xlu1 %2088 }
0x144c   :  { %3700 = vmatprep.subr.bf16.mxu1 %v3699_v54 }
0x144d   :  { %3702 = vmatpush3.bf16.msra.mxu1 %v3699_v54 }
0x144f   :  { %v2091_v3 = vpop.permute.xlu1 %2090 }
0x1451   :  { %v3955_v53 = vpop.eup %3954 }
0x1452   :  { %v1994_v17 = vsel %vm281_vm3, %v3955_v53, 0.0  ;;  %v3957_v51 = vpop.eup %3956 }
0x1453   :  { %1995 = vadd.xlane.f32.xlu0 %v1994_v17  ;;  %v1991_v15 = vsel %vm281_vm3, %v3957_v51, 0.0 }
0x1457   :  { %1992 = vadd.xlane.f32.xlu0 %v1991_v15 }
0x146d   :  { %3881 = vrot.lane.b32.xlu0 %v4381_v58, %s4773_s1 }
0x14e0   :  { %v1996_v52 = vpop.xlane.xlu0 %1995 }
0x14e1   :  { %3958 = vrcp.f32 %v1996_v52 }
0x14e4   :  { %v1993_v55 = vpop.xlane.xlu0 %1992 }
0x14e5   :  { %3960 = vrcp.f32 %v1993_v55 }
0x14e8   :  { %v3882_v56 = vpop.permute.xlu0 %3881 }
0x14e9   :  { %v3884_v59 = vunpack.i.h.bf16 %v3882_v56  ;;  %v3883_v61 = vunpack.i.l.bf16 %v3882_v56 }
0x14eb   :  { %v3703_v62 = vpack.c.bf16 %v3884_v59, %v3883_v61  ;;  %v3959_v63 = vpop.eup %3958 }
0x14ec   :  { %v2000_v60 = vmul.f32 %v3959_v63, %v3955_v53 }
0x14ed   :  { %3705 = vmatprep.subr.msk.bf16.mxu1 %vm4151_vm2, %v3703_v62 }
0x14ef   :  { %v3961_v0 = vpop.eup %3960 }
0x14f0   :  { %v1999_v1 = vmul.f32 %v3961_v0, %v3957_v51 }
0x14f2   :  { %3516 = vmatprep.mubr.msk.f32.mxu1 %vm281_vm3, %v1999_v1 }
0x14f3   :  { %3517 = vmatmul.mubr.msk.f32.vlgmr.msra.gmra.mrb[18].mxu1 %vm281_vm3, %v2000_v60 }
0x14f4   :  { %3708 = vmatpush3.bf16.xpose.msk.msra.mxu1 %vm4151_vm2, %v3703_v62  ;;  %3523 = vmatprep.mubr.msk.f32.mxu1 %vm197_vm1, %v2089_v2 }
0x14fb   :  { %3524 = vmatmul.mubr.msk.f32.vlgmr.msra.gmra.mrb[20].mxu1 %vm197_vm1, %v2091_v3 }
0x15c6   :  { %v3518_v4 = vpop.f32.mrb[18].mxu1 }
0x15c7   :  { %v2079_v5 = vpop.f32.mrb[19].mxu1 }
0x15ce   :  { %v3525_v6 = vpop.f32.mrb[20].mxu1 }
0x15cf   :  { %v2176_v7 = vadd.f32 %v3988_v32, %v3525_v6  ;;  %v2170_v8 = vpop.f32.mrb[21].mxu1 }
0x15d0   :  { %v2171_v9 = vadd.f32 %v3989_v33, %v2170_v8  ;;  %v3164_v33 = vld [vmem:[%s4738_s7 + $0x30] sm:$0xff]  ;;  %v3172_v8 = vld [vmem:[%s4739_s8 + $0x28] sm:$0xff] }
0x15d1   :  { %v2182_v10 = vsel %vm281_vm3, %v2176_v7, -inf  ;;  %v3717_v39 = vpack.c.bf16 %v3165_v37, %v3164_v33  ;;  %v3182_v33 = vld [vmem:[%s4740_s9 + $0x60] sm:$0xff]  ;;  %v3183_v37 = vld [vmem:[%s4740_s9 + $0x68] sm:$0xff] }
0x15d2   :  { %2183 = vmax.xlane.f32.xlu0 %v2182_v10  ;;  %v2179_v11 = vsel %vm281_vm3, %v2171_v9, -inf  ;;  %v3173_v10 = vld [vmem:[%s4739_s8 + $0x30] sm:$0xff] }
0x15d3   :  { %2180 = vmax.xlane.f32.xlu1 %v2179_v11  ;;  %v3174_v11 = vld [vmem:[%s4739_s8 + $0x38] sm:$0xff] }
0x15e4   :  { %3886 = vrot.lane.b32.xlu1 %v4381_v58, %s4774_s24 }
0x15e8   :  { %2292 = vrot.lane.b32.xlu1 %v4439_v29, %s4775_s19 }
0x15ec   :  { %2298 = vrot.lane.b32.xlu1 %v2079_v5, %s4776_s20 }
0x15f0   :  { %2300 = vrot.lane.b32.xlu1 %v3518_v4, %s4776_s20 }
0x165f   :  { %v2184_v48 = vpop.xlane.xlu0 %2183 }
0x1660   :  { %v2186_v12 = vsub.f32 %v2176_v7, %v2184_v48  ;;  %v2181_v14 = vpop.xlane.xlu1 %2180  ;;  %v3725_v48 = vpack.c.bf16 %v3174_v11, %v3173_v10 }
0x1661   :  { %v2185_v38 = vsub.f32 %v2171_v9, %v2181_v14 }
0x1662   :  { %v2189_v16 = vmul.f32 1.442695, %v2186_v12 }
0x1663   :  { %v2187_v18 = vmul.f32 1.442695, %v2185_v38 }
0x1664   :  { %v3887_v19 = vpop.permute.xlu1 %3886 }
0x1665   :  { %3962 = vpow2.f32 %v2187_v18  ;;  %v3889_v57 = vunpack.i.h.bf16 %v3887_v19  ;;  %v3888_v20 = vunpack.i.l.bf16 %v3887_v19 }
0x1666   :  { %3964 = vpow2.f32 %v2189_v16 }
0x1667   :  { %v3709_v21 = vpack.c.bf16 %v3889_v57, %v3888_v20  ;;  %v3169_v20 = vld [vmem:[%s4735_s3 + $0x9] ss:$0 sm:$0xff] }
0x1668   :  { %v2293_v44 = vpop.permute.xlu1 %2292 }
0x1669   :  { %3710 = vmatprep.subr.bf16.mxu0 %v3709_v21  ;;  %v2313_v50 = vsel %vm197_vm1, %v4435_v27, %v2293_v44 }
0x166a   :  { %3712 = vmatpush3.bf16.msra.mxu0 %v3709_v21 }
0x166c   :  { %v2299_v45 = vpop.permute.xlu1 %2298 }
0x166f   :  { %v3963_v58 = vpop.eup %3962 }
0x1670   :  { %v2191_v22 = vsel %vm281_vm3, %v3963_v58, 0.0  ;;  %v3965_v23 = vpop.eup %3964  ;;  %v2301_v47 = vpop.permute.xlu1 %2300 }
0x1671   :  { %2192 = vadd.xlane.f32.xlu0 %v2191_v22  ;;  %v2194_v24 = vsel %vm281_vm3, %v3965_v23, 0.0  ;;  %v2315_v17 = vsel %vm281_vm3, %v2313_v50, %v2301_v47 }
0x1675   :  { %2195 = vadd.xlane.f32.xlu0 %v2194_v24 }
0x168b   :  { %2290 = vrot.lane.b32.xlu0 %v4441_v30, %s4775_s19  ;;  %v3163_v30 = vld [vmem:[%s4738_s7 + $0x28] sm:$0xff] }
0x168c   :  { %v3713_v36 = vpack.c.bf16 %v3163_v30, %v3162_v35  ;;  %v3180_v35 = vld [vmem:[%s4740_s9 + $0x50] sm:$0xff]  ;;  %v3181_v30 = vld [vmem:[%s4740_s9 + $0x58] sm:$0xff] }
0x168e   :  { %3714 = vmatprep.subr.bf16.mxu0 %v3713_v36 }
0x16fe   :  { %v2193_v25 = vpop.xlane.xlu0 %2192 }
0x16ff   :  { %3966 = vrcp.f32 %v2193_v25 }
0x1702   :  { %v2196_v26 = vpop.xlane.xlu0 %2195 }
0x1703   :  { %3968 = vrcp.f32 %v2196_v26 }
0x1706   :  { %v2291_v46 = vpop.permute.xlu0 %2290 }
0x1707   :  { %v2312_v49 = vsel %vm197_vm1, %v4437_v28, %v2291_v46  ;;  %v3166_v28 = vld [vmem:[%s4735_s3 + $0x8] ss:$0 sm:$0xff] }
0x1708   :  { %v2314_v54 = vsel %vm281_vm3, %v2312_v49, %v2299_v45  ;;  %v3175_v45 = vld [vmem:[%s4741_s5 + $0x1] ss:$0 sm:$0xff] }
0x1709   :  { %v3967_v29 = vpop.eup %3966 }
0x170a   :  { %v2199_v31 = vmul.f32 %v3967_v29, %v3963_v58  ;;  %v3170_v58 = vld [vmem:[%s4735_s3 + $0xa] ss:$0 sm:$0xff] }
0x170c   :  { %3530 = vmatprep.mubr.msk.f32.mxu0 %vm281_vm3, %v2199_v31  ;;  %v3178_v31 = vld [vmem:[%s4740_s9 + $0x40] sm:$0xff] }
0x170d   :  { %v3969_v32 = vpop.eup %3968 }
0x170e   :  { %v2200_v34 = vmul.f32 %v3969_v32, %v3965_v23  ;;  %v3179_v32 = vld [vmem:[%s4740_s9 + $0x48] sm:$0xff] }
0x1710   :  { %3531 = vmatmul.mubr.msk.f32.vlgmr.msra.gmra.mrb[18].mxu0 %vm281_vm3, %v2200_v34  ;;  %v3729_v34 = vpack.c.bf16 %v3179_v32, %v3178_v31 }
0x1711   :  { %3716 = vmatpush3.bf16.msra.mxu0 %v3713_v36  ;;  %v3733_v36 = vpack.c.bf16 %v3181_v30, %v3180_v35 }
0x1712   :  { %3718 = vmatprep.subr.bf16.mxu0 %v3717_v39 }
0x1715   :  { %3720 = vmatpush3.bf16.msra.mxu0 %v3717_v39  ;;  %v3737_v39 = vpack.c.bf16 %v3183_v37, %v3182_v33  ;;  %v3189_v33 = vld [vmem:[%s4735_s3 + $0xc] ss:$0 sm:$0xff] }
0x1716   :  { %3730 = vmatprep.subr.bf16.mxu0 %v3729_v34 }
0x17e3   :  { %v3532_v42 = vpop.f32.mrb[18].mxu0 }
0x17e4   :  { %2308 = vrot.lane.b32.xlu1 %v3532_v42, %s4777_s26  ;;  %v2279_v43 = vpop.f32.mrb[19].mxu0  ;;  %v3184_v42 = vld [vmem:[%s4740_s9 + $0x70] sm:$0xff] }
0x17e5   :  { %2306 = vrot.lane.b32.xlu0 %v2279_v43, %s4777_s26  ;;  %v3185_v43 = vld [vmem:[%s4740_s9 + $0x78] sm:$0xff] }
0x17e6   :  { %v3741_v44 = vpack.c.bf16 %v3185_v43, %v3184_v42  ;;  %v3190_v42 = vld [vmem:[%s4735_s3 + $0xd] ss:$0 sm:$0xff] }
0x1856   :  { %v2309_v41 = vpop.permute.xlu1 %2308 }
0x1857   :  { %v2307_v53 = vpop.permute.xlu0 %2306  ;;  %v2317_v15 = vsel %vm1019_vm4, %v2315_v17, %v2309_v41 }
0x1858   :  { %v2316_v51 = vsel %vm1019_vm4, %v2314_v54, %v2307_v53 }
0x1859   :  { %3541 = vmatprep.mubr.msk.f32.mxu0 %vm59_vm0, %v2316_v51 }
0x185a   :  { %3542 = vmatmul.mubr.msk.f32.vlgmr.msra.gmra.mrb[20].mxu0 %vm59_vm0, %v2317_v15 }
0x185b   :  { %3732 = vmatpush3.bf16.msra.mxu0 %v3729_v34 }
0x185c   :  { %3734 = vmatprep.subr.bf16.mxu0 %v3733_v36 }
0x185f   :  { %3736 = vmatpush3.bf16.msra.mxu0 %v3733_v36 }
0x1860   :  { %3738 = vmatprep.subr.bf16.mxu0 %v3737_v39 }
0x1863   :  { %3740 = vmatpush3.bf16.msra.mxu0 %v3737_v39 }
0x1864   :  { %3742 = vmatprep.subr.bf16.mxu0 %v3741_v44 }
0x1867   :  { %3744 = vmatpush3.bf16.msra.mxu0 %v3741_v44 }
0x192d   :  { %v3543_v52 = vpop.f32.mrb[20].mxu0 }
0x192e   :  { %v2406_v55 = vadd.f32 %v3543_v52, %v3166_v28  ;;  %v2400_v27 = vpop.f32.mrb[21].mxu0 }
0x192f   :  { %v2401_v56 = vadd.f32 %v3166_v28, %v2400_v27 }
0x1930   :  { %v2410_v59 = vadd.f32 %v2406_v55, %v4364_v40 }
0x1931   :  { %v2409_v61 = vadd.f32 %v2401_v56, %v4362_v13  ;;  %v3171_v13 = vld [vmem:[%s4739_s8 + $0x20] sm:$0xff] }
0x1932   :  { %v2416_v62 = vsel %vm59_vm0, %v2410_v59, 0.0  ;;  %v3721_v9 = vpack.c.bf16 %v3172_v8, %v3171_v13 }
0x1933   :  { %2417 = vadd.xlane.f32.xlu1 %v2416_v62  ;;  %v2413_v63 = vsel %vm59_vm0, %v2409_v61, 0.0 }
0x1934   :  { %2414 = vadd.xlane.f32.xlu0 %v2413_v63  ;;  %3722 = vmatprep.subr.bf16.mxu1 %v3721_v9 }
0x1935   :  { %3724 = vmatpush3.bf16.msra.mxu1 %v3721_v9 }
0x1936   :  { %3726 = vmatprep.subr.bf16.mxu1 %v3725_v48 }
0x1939   :  { %3728 = vmatpush3.bf16.msra.mxu1 %v3725_v48 }
0x19c0   :  { %v2418_v0 = vpop.xlane.xlu1 %2417 }
0x19c1   :  { %v2420_v1 = vmul.f32 0.03125, %v2418_v0  ;;  %v2415_v60 = vpop.xlane.xlu0 %2414 }
0x19c2   :  { %v2419_v2 = vmul.f32 0.03125, %v2415_v60 }
0x19c3   :  { %v2422_v3 = vsub.f32 %v2410_v59, %v2420_v1 }
0x19c4   :  { %v2421_v4 = vsub.f32 %v2409_v61, %v2419_v2  ;;  %v3186_v2 = vld [vmem:[%s4735_s3 + $0xb] ss:$0 sm:$0xff] }
0x19c5   :  { %v2424_v7 = vmul.f32 %v2422_v3, %v2422_v3 }
0x19c6   :  { %v2423_v5 = vmul.f32 %v2421_v4, %v2421_v4 }
0x19c7   :  { %v2428_v40 = vsel %vm59_vm0, %v2424_v7, 0.0 }
0x19c8   :  { %v2425_v6 = vsel %vm59_vm0, %v2423_v5, 0.0 }
0x19c9   :  { %2426 = vadd.xlane.f32.xlu0 %v2425_v6 }
0x19cd   :  { %2429 = vadd.xlane.f32.xlu0 %v2428_v40 }
0x1a56   :  { %v2427_v12 = vpop.xlane.xlu0 %2426 }
0x1a57   :  { %v2431_v14 = vmul.f32 0.03125, %v2427_v12 }
0x1a59   :  { %v2433_v38 = vadd.f32 1e-12, %v2431_v14 }
0x1a5a   :  { %v2430_v16 = vpop.xlane.xlu0 %2429 }
0x1a5b   :  { %3970 = vrsqrt.f32 %v2433_v38  ;;  %v2432_v18 = vmul.f32 0.03125, %v2430_v16 }
0x1a5d   :  { %v2434_v19 = vadd.f32 1e-12, %v2432_v18 }
0x1a5f   :  { %3972 = vrsqrt.f32 %v2434_v19 }
0x1a65   :  { %v3971_v57 = vpop.eup %3970 }
0x1a66   :  { %v2437_v21 = vmul.f32 %v3971_v57, %v2421_v4  ;;  %v2702_v57 = vld [vmem:[%s4742_s10] sm:$0xff] }
0x1a68   :  { %v2443_v22 = vmul.f32 %v3169_v20, %v2437_v21 }
0x1a69   :  { %v3973_v23 = vpop.eup %3972 }
0x1a6a   :  { %v2438_v24 = vmul.f32 %v3973_v23, %v2422_v3  ;;  %v2449_v25 = vadd.f32 %v3170_v58, %v2443_v22  ;;  %v2704_v22 = vld [vmem:[%s4742_s10 + $0x10] sm:$0xff]  ;;  %v2705_v23 = vld [vmem:[%s4742_s10 + $0x18] sm:$0xff] }
0x1a6c   :  { %v2444_v26 = vmul.f32 %v3169_v20, %v2438_v24  ;;  %3552 = vmatprep.mubr.msk.f32.mxu1 %vm59_vm0, %v2449_v25  ;;  %v2703_v20 = vld [vmem:[%s4742_s10 + $0x8] sm:$0xff]  ;;  %v3749_v24 = vpack.c.bf16 %v2705_v23, %v2704_v22  ;;  %v2976_v22 = vld [vmem:[%s4746_s14 + $0x40] sm:$0xff] }
0x1a6d   :  { %v3746_v21 = vpack.c.bf16 %v2703_v20, %v2702_v57  ;;  %v2992_v57 = vld [vmem:[%s4746_s14 + $0xc0] sm:$0xff]  ;;  %v2993_v20 = vld [vmem:[%s4746_s14 + $0xc8] sm:$0xff] }
0x1a6e   :  { %v2450_v29 = vadd.f32 %v3170_v58, %v2444_v26  ;;  %v4004_v58 = vmov 0.0|0.0   ;;  %v2977_v23 = vld [vmem:[%s4746_s14 + $0x48] sm:$0xff] }
0x1a6f   :  { %3745 = vmatprep.subr.bf16.mxu1 %v4004_v58 }
0x1a70   :  { %3553 = vmatmul.mubr.msk.f32.vlgmr.msra.gmra.mrb[22].mxu1 %vm59_vm0, %v2450_v29 }
0x1a71   :  { %3747 = vmatpush3.bf16.msra.mxu1 %v3746_v21 }
0x1a72   :  { %3748 = vmatprep.subr.bf16.mxu1 %v4004_v58  ;;  %v3775_v58 = vpack.c.bf16 %v2993_v20, %v2992_v57 }
0x1a75   :  { %3750 = vmatpush3.bf16.msra.mxu1 %v3749_v24  ;;  %v2994_v24 = vld [vmem:[%s4746_s14 + $0xd0] sm:$0xff] }
0x1b43   :  { %v3554_v46 = vpop.f32.mrb[22].mxu1 }
0x1b44   :  { %v2539_v47 = vadd.f32 %v3554_v46, %v3175_v45  ;;  %v2533_v49 = vpop.f32.mrb[23].mxu1 }
0x1b45   :  { %v2534_v41 = vadd.f32 %v3175_v45, %v2533_v49 }
0x1b46   :  { %v2545_v50 = vmul.f32 0.044715, %v2539_v47  ;;  %v2543_v0 = vmul.f32 0.5, %v2539_v47 }
0x1b47   :  { %v2544_v54 = vmul.f32 0.044715, %v2534_v41  ;;  %v2542_v62 = vmul.f32 0.5, %v2534_v41 }
0x1b48   :  { %v2547_v53 = vmul.f32 %v2545_v50, %v2539_v47  ;;  %v2795_v50 = vld [vmem:[%s4743_s12 + $0x8] sm:$0x1f] }
0x1b49   :  { %v2546_v17 = vmul.f32 %v2544_v54, %v2534_v41  ;;  %v2786_v54 = vld [vmem:[%s4744_s11 + $0x8] sm:$0xff]  ;;  %3193 = vmatprep.subr.msk.mxu1 %vm2800_vm8, %v2795_v50  ;;  %v2982_v50 = vld [vmem:[%s4746_s14 + $0x70] sm:$0xff] }
0x1b4a   :  { %v2549_v51 = vmul.f32 %v2547_v53, %v2539_v47  ;;  %v2788_v53 = vld [vmem:[%s4744_s11 + $0x18] sm:$0xff] }
0x1b4b   :  { %v2548_v15 = vmul.f32 %v2546_v17, %v2534_v41  ;;  %v2793_v17 = vld [vmem:[%s4745_s2] sm:$0x3] }
0x1b4c   :  { %v2551_v28 = vadd.f32 %v2549_v51, %v2539_v47  ;;  %v2785_v51 = vld [vmem:[%s4744_s11] sm:$0xff] }
0x1b4d   :  { %v2550_v52 = vadd.f32 %v2548_v15, %v2534_v41  ;;  %v2794_v41 = vld [vmem:[%s4743_s12] sm:$0x1f]  ;;  %v3751_v15 = vpack.c.bf16 %v2788_v53, %v2786_v54  ;;  %v2983_v54 = vld [vmem:[%s4746_s14 + $0x78] sm:$0xff] }
0x1b4e   :  { %v2553_v55 = vmul.f32 0.7978846, %v2551_v28  ;;  %v2787_v28 = vld [vmem:[%s4744_s11 + $0x10] sm:$0xff]  ;;  %v3789_v53 = vpack.c.bf16 %v2983_v54, %v2982_v50 }
0x1b4f   :  { %v2552_v27 = vmul.f32 0.7978846, %v2550_v52  ;;  %v2790_v52 = vld [vmem:[%s4744_s11 + $0x28] sm:$0xff] }
0x1b50   :  { %3974 = vtanh.f32 %v2553_v55  ;;  %v2792_v55 = vld [vmem:[%s4744_s11 + $0x38] sm:$0xff] }
0x1b51   :  { %3976 = vtanh.f32 %v2552_v27  ;;  %v3753_v27 = vpack.c.bf16 %v2787_v28, %v2785_v51  ;;  %v2952_v28 = vld [vmem:[%s4747_s13] sm:$0x3] }
0x1b5a   :  { %v3975_v56 = vpop.eup %3974 }
0x1b5b   :  { %v3977_v59 = vpop.eup %3976  ;;  %v2557_v61 = vadd.f32 1.0, %v3975_v56  ;;  %v3755_v56 = vpack.c.bf16 %v2792_v55, %v2790_v52 }
0x1b5c   :  { %v2556_v63 = vadd.f32 1.0, %v3977_v59  ;;  %v2789_v59 = vld [vmem:[%s4744_s11 + $0x20] sm:$0xff] }
0x1b5d   :  { %v2559_v60 = vmul.f32 %v2557_v61, %v2543_v0  ;;  %v2791_v61 = vld [vmem:[%s4744_s11 + $0x30] sm:$0xff]  ;;  %v2985_v0 = vld [vmem:[%s4746_s14 + $0x88] sm:$0xff] }
0x1b5e   :  { %v2558_v1 = vmul.f32 %v2556_v63, %v2542_v62  ;;  %v3757_v62 = vpack.c.bf16 %v2791_v61, %v2789_v59  ;;  %v2984_v63 = vld [vmem:[%s4746_s14 + $0x80] sm:$0xff] }
0x1b60   :  { %3571 = vmatprep.mubr.msk.f32.mxu0 %vm1275_vm5, %v2558_v1  ;;  %v2968_v1 = vld [vmem:[%s4746_s14] sm:$0xff] }
0x1b61   :  { %3572 = vmatmul.mubr.msk.f32.vlgmr.msra.gmra.mrb[22].mxu0 %vm1275_vm5, %v2559_v60  ;;  %v3759_v60 = vpack.c.bf16 %v2985_v0, %v2984_v63 }
0x1b63   :  { %3760 = vmatprep.subr.bf16.mxu0 %v3759_v60 }
0x1c34   :  { %v3573_v3 = vpop.f32.mrb[22].mxu0 }
0x1c35   :  { %v2652_v4 = vadd.f32 %v3573_v3, %v3186_v2  ;;  %v2646_v5 = vpop.f32.mrb[23].mxu0  ;;  %v2986_v3 = vld [vmem:[%s4746_s14 + $0x90] sm:$0xff] }
0x1c36   :  { %v2647_v6 = vadd.f32 %v3186_v2, %v2646_v5  ;;  %v2969_v2 = vld [vmem:[%s4746_s14 + $0x8] sm:$0xff] }
0x1c37   :  { %v2656_v7 = vadd.f32 %v2652_v4, %v2450_v29  ;;  %v2987_v4 = vld [vmem:[%s4746_s14 + $0x98] sm:$0xff]  ;;  %v3761_v5 = vpack.c.bf16 %v2969_v2, %v2968_v1  ;;  %v21_v1 = vstv %s4748_s15 }
0x1c38   :  { %v2655_v40 = vadd.f32 %v2647_v6, %v2449_v25  ;;  %v4006_v25 = vmov 0.0   ;;  %v3763_v6 = vpack.c.bf16 %v2987_v4, %v2986_v3  ;;  %22 = vst [vmem:[#allocation2] sm:$0x1] %v21_v1 }
0x1c39   :  { %v2662_v13 = vsel %vm59_vm0, %v2656_v7, 0.0  ;;  %3582 = vmatprep.mubr.msk.f32.mxu1 %vm4005_vm6, %v4006_v25  ;;  %3762 = vmatpush3.bf16.msra.mxu0 %v3761_v5 }
0x1c3a   :  { %2663 = vadd.xlane.f32.xlu0 %v2662_v13  ;;  %v2659_v8 = vsel %vm59_vm0, %v2655_v40, 0.0  ;;  %v2988_v13 = vld [vmem:[%s4746_s14 + $0xa0] sm:$0xff]  ;;  %3764 = vmatprep.subr.bf16.mxu0 %v3763_v6 }
0x1c3b   :  { %2660 = vadd.xlane.f32.xlu1 %v2659_v8  ;;  %v2989_v8 = vld [vmem:[%s4746_s14 + $0xa8] sm:$0xff] }
0x1c3f   :  { %v3197_v2 = vld [vmem:[#allocation2] ss:$0 sm:$0xff] }
0x1cc7   :  { %v2664_v9 = vpop.xlane.xlu0 %2663 }
0x1cc8   :  { %v2666_v10 = vmul.f32 0.03125, %v2664_v9  ;;  %v2661_v11 = vpop.xlane.xlu1 %2660 }
0x1cc9   :  { %v2665_v48 = vmul.f32 0.03125, %v2661_v11  ;;  %v2972_v11 = vld [vmem:[%s4746_s14 + $0x20] sm:$0xff] }
0x1cca   :  { %v2668_v12 = vsub.f32 %v2656_v7, %v2666_v10  ;;  %v2970_v7 = vld [vmem:[%s4746_s14 + $0x10] sm:$0xff]  ;;  %v3767_v10 = vpack.c.bf16 %v2989_v8, %v2988_v13 }
0x1ccb   :  { %v2667_v14 = vsub.f32 %v2655_v40, %v2665_v48  ;;  %v2971_v40 = vld [vmem:[%s4746_s14 + $0x18] sm:$0xff]  ;;  %v2973_v48 = vld [vmem:[%s4746_s14 + $0x28] sm:$0xff] }
0x1ccc   :  { %v2670_v38 = vmul.f32 %v2668_v12, %v2668_v12  ;;  %v3765_v9 = vpack.c.bf16 %v2971_v40, %v2970_v7 }
0x1ccd   :  { %v2669_v16 = vmul.f32 %v2667_v14, %v2667_v14 }
0x1cce   :  { %v2674_v18 = vsel %vm59_vm0, %v2670_v38, 0.0  ;;  %3766 = vmatpush3.bf16.msra.mxu0 %v3765_v9  ;;  %v3769_v38 = vpack.c.bf16 %v2973_v48, %v2972_v11 }
0x1ccf   :  { %2675 = vadd.xlane.f32.xlu0 %v2674_v18  ;;  %v2671_v19 = vsel %vm59_vm0, %v2669_v16, 0.0  ;;  %3768 = vmatprep.subr.bf16.mxu0 %v3767_v10  ;;  %v2974_v18 = vld [vmem:[%s4746_s14 + $0x30] sm:$0xff] }
0x1cd0   :  { %2672 = vadd.xlane.f32.xlu1 %v2671_v19  ;;  %v2975_v19 = vld [vmem:[%s4746_s14 + $0x38] sm:$0xff] }
0x1cd1   :  { %v3773_v21 = vpack.c.bf16 %v2975_v19, %v2974_v18 }
0x1cd2   :  { %3770 = vmatpush3.bf16.msra.mxu0 %v3769_v38 }
0x1d5c   :  { %v2676_v26 = vpop.xlane.xlu0 %2675 }
0x1d5d   :  { %v2678_v29 = vmul.f32 0.03125, %v2676_v26  ;;  %v2673_v31 = vpop.xlane.xlu1 %2672  ;;  %v3777_v26 = vpack.c.bf16 %v2977_v23, %v2976_v22 }
0x1d5e   :  { %v2677_v32 = vmul.f32 0.03125, %v2673_v31  ;;  %v2978_v31 = vld [vmem:[%s4746_s14 + $0x50] sm:$0xff] }
0x1d5f   :  { %v2680_v34 = vadd.f32 1e-12, %v2678_v29 }
0x1d60   :  { %v2679_v35 = vadd.f32 1e-12, %v2677_v32  ;;  %v2979_v32 = vld [vmem:[%s4746_s14 + $0x58] sm:$0xff] }
0x1d61   :  { %3978 = vrsqrt.f32 %v2680_v34  ;;  %v2996_v34 = vld [vmem:[%s4746_s14 + $0xe0] sm:$0xff] }
0x1d62   :  { %3980 = vrsqrt.f32 %v2679_v35  ;;  %v2997_v35 = vld [vmem:[%s4746_s14 + $0xe8] sm:$0xff] }
0x1d6b   :  { %v3979_v30 = vpop.eup %3978 }
0x1d6c   :  { %v3981_v36 = vpop.eup %3980  ;;  %v2684_v37 = vmul.f32 %v3979_v30, %v2668_v12  ;;  %v2990_v12 = vld [vmem:[%s4746_s14 + $0xb0] sm:$0xff]  ;;  %v3781_v30 = vpack.c.bf16 %v2979_v32, %v2978_v31 }
0x1d6d   :  { %v2683_v39 = vmul.f32 %v3981_v36, %v2667_v14  ;;  %v2991_v14 = vld [vmem:[%s4746_s14 + $0xb8] sm:$0xff]  ;;  %v3191_v36 = vld [vmem:[%s4735_s3 + $0xe] ss:$0 sm:$0xff] }
0x1d6e   :  { %v2690_v43 = vmul.f32 %v3189_v33, %v2684_v37  ;;  %v3771_v16 = vpack.c.bf16 %v2991_v14, %v2990_v12 }
0x1d6f   :  { %v2689_v44 = vmul.f32 %v3189_v33, %v2683_v39  ;;  %v3783_v33 = vpack.c.bf16 %v2997_v35, %v2996_v34 }
0x1d70   :  { %v2696_v45 = vadd.f32 %v3190_v42, %v2690_v43  ;;  %3772 = vmatprep.subr.bf16.mxu0 %v3771_v16 }
0x1d71   :  { %v2695_v46 = vadd.f32 %v3190_v42, %v2689_v44  ;;  %3774 = vmatpush3.bf16.msra.mxu0 %v3773_v21  ;;  %v2980_v44 = vld [vmem:[%s4746_s14 + $0x60] sm:$0xff] }
0x1d72   :  { %v2698_v47 = vrot.slane %v2696_v45, 7  ;;  %3776 = vmatprep.subr.bf16.mxu0 %v3775_v58  ;;  %v2981_v45 = vld [vmem:[%s4746_s14 + $0x68] sm:$0xff] }
0x1d74   :  { %v2701_v49 = vsel %vm2700_vm7, %v2695_v46, %v2698_v47  ;;  %v3785_v46 = vpack.c.bf16 %v2981_v45, %v2980_v44  ;;  %v2998_v47 = vld [vmem:[%s4746_s14 + $0xf0] sm:$0xff] }
0x1d75   :  { %3583 = vmatmul.mubr.msk.f32.vlgmr.msra.gmra.mrb[24].mxu1 %vm59_vm0, %v2701_v49  ;;  %3778 = vmatpush3.bf16.msra.mxu0 %v3777_v26  ;;  %v2999_v49 = vld [vmem:[%s4746_s14 + $0xf8] sm:$0xff] }
0x1d76   :  { %2871 = vmatprep.mubr.f32.mxu1 %v4006_v25  ;;  %3194 = vmatpush1.msk.msra.mxu1 %vm2800_vm8, %v2794_v41  ;;  %v3787_v41 = vpack.c.bf16 %v2999_v49, %v2998_v47 }
0x1d77   :  { %3752 = vmatprep.subr.bf16.mxu1 %v3751_v15 }
0x1d79   :  { %3195 = vmatmul.mubr.msk.f32.vlgmr.msra.gmra.mrb[26].mxu1 %vm2796_vm9, %v2793_v17  ;;  %v2954_v17 = vlaneseq }
0x1d7a   :  { %2945 = vmatprep.mubr.f32.mxu1 %v4006_v25  ;;  %3754 = vmatpush1.bf16.msra.mxu1 %v3753_v27  ;;  %v2995_v25 = vld [vmem:[%s4746_s14 + $0xd8] sm:$0xff] }
0x1d7b   :  { %3756 = vmatprep.subr.bf16.mxu1 %v3755_v56  ;;  %v3779_v29 = vpack.c.bf16 %v2995_v25, %v2994_v24  ;;  %v2955_v51 = vshrl.u32 %v2954_v17, 7 }
0x1d7d   :  { %3780 = vmatprep.subr.bf16.mxu0 %v3779_v29  ;;  %v2956_v15 = vsub.s32 0, %v2955_v51  ;;  %v2960_v52 = vsub.s32 1, %v2955_v51 }
0x1d7e   :  { %3758 = vmatpush1.bf16.msra.mxu1 %v3757_v62  ;;  %3782 = vmatpush3.bf16.msra.mxu0 %v3781_v30 }
0x1d7f   :  { %3784 = vmatprep.subr.bf16.mxu0 %v3783_v33  ;;  %v2957_v55 = vrot.slane %v2952_v28, %v2956_v15  ;;  %v2961_v27 = vrot.slane %v2952_v28, %v2960_v52 }
0x1d82   :  { %3786 = vmatpush3.bf16.msra.mxu0 %v3785_v46 }
0x1d83   :  { %3788 = vmatprep.subr.bf16.mxu0 %v3787_v41 }
0x1d86   :  { %3790 = vmatpush3.bf16.msra.mxu0 %v3789_v53 }
0x1e48   :  { %v2780_v37 = vpop.f32.mrb[24].mxu1 }
0x1e49   :  { %v2781_v39 = vadd.f32 %v3191_v36, %v2780_v37  ;;  %v3584_v42 = vpop.f32.mrb[25].mxu1 }
0x1e4b   :  { %3982 = vtanh.f32 %v2781_v39 }
0x1e55   :  { %v3983_v43 = vpop.eup %3982 }
0x1e56   :  { %3196 = vmatmul.mubr.msk.f32.vlgmr.msra.gmra.mrb[26].mxu1 %vm59_vm0, %v3983_v43 }
0x1f29   :  { %v2947_v56 = vpop.f32.mrb[26].mxu1 }
0x1f2a   :  { %v2964_v59 = vadd.f32 %v2957_v55, %v2947_v56  ;;  %v2949_v61 = vpop.f32.mrb[27].mxu1 }
0x1f2b   :  { %v2965_v62 = vadd.f32 %v2961_v27, %v2949_v61 }
0x1f2c   :  { %v2966_v0 = vmax.f32 %v2964_v59, 0.0 }
0x1f2d   :  { %v2967_v63 = vmax.f32 %v2965_v62, 0.0 }
0x1f2f   :  { %3071 = vmatprep.mubr.f32.mxu0 %v2967_v63 }
0x1f30   :  { %3072 = vmatmul.mubr.f32.vlgmr.msra.gmra.mrb[24].mxu0 %v2966_v0 }
0x2003   :  { %v3355_v60 = vpop.f32.mrb[24].mxu0 }
0x2004   :  { %v3356_v3 = vpop.f32.mrb[25].mxu0 }
0x2005   :  { %v3357_v4 = vadd.f32 %v3356_v3, %v3355_v60 }
0x2007   :  { %v3074_v5 = vadd.f32 %v3357_v4, %v3197_v2 }
0x2009   :  { %v3077_v6 = vsub.f32 0.0, %v3074_v5 }
0x200b   :  { %v3078_v7 = vmul.f32 1.442695, %v3077_v6 }
0x200d   :  { %3984 = vpow2.f32 %v3078_v7 }
0x2017   :  { %v3985_v40 = vpop.eup %3984 }
0x2018   :  { %v3080_v13 = vadd.f32 1.0, %v3985_v40 }
0x201a   :  { %3986 = vrcp.f32 %v3080_v13 }
0x2024   :  { %v3987_v8 = vpop.eup %3986 }
0x2025   :  { %3084 = vst.msk [vmem:[%s4749_s16] sm:$0x3] %vm3083_vm10, %v3987_v8 }

</bundles_post_ra>
